<compile_context>
chip_gen: v6e
topology: v6e:2x2x1
jax: 0.10.0
libtpu: 0.0.40
codegen_flags: <defaults>
</compile_context>

<pallas_src>
import functools

import jax
import jax.numpy as jnp
import numpy as np
from jax import lax
from jax.experimental import pallas as pl
from jax.experimental.pallas import tpu as pltpu

EPS = 1e-5  # nn.InstanceNorm2d default (affine=False, track_running_stats=False)


def _rk_kernel(xp_ref, w1_ref, w2_ref, msk_ref, out_ref, col_ref, t_ref,
               *, H, W):
    # xp_ref : (C, M+P+M) f32  reflection-padded image, row-major flattened
    #                          (H+2, W+2) grid at lane offset M, zero margins.
    # w*_ref : (C, 9*C)   bf16 conv weights, columns ordered (dy, dx, c_in).
    # msk_ref: (3, P)     f32  [interior, padded col==0, padded col==W+1].
    # out_ref: (C, P)     f32  result on the padded grid (wrapper slices it).
    # col_ref: (9*C, P)   f32  shared im2col scratch (both convs).
    # t_ref  : (C, M+P+M) f32  reflect-padded intermediate scratch.
    Wp = W + 2
    P = (H + 2) * Wp
    M = (xp_ref.shape[1] - P) // 2           # lane margin (= Wp + 1)
    C = out_ref.shape[0]
    inv_hw = jnp.float32(1.0 / (H * W))

    m_in = msk_ref[0:1, :]                   # 1.0 inside, 0.0 on the ring
    m_lft = msk_ref[1:2, :] > 0.5            # padded column 0
    m_rgt = msk_ref[2:3, :] > 0.5            # padded column W+1

    def conv3x3(src_ref, w_ref):
        # "same"-style conv on the padded grid.  Each tap is a contiguous
        # static lane slice of src_ref (no retiling); one K=9C matmul with the
        # spatial grid on lanes.  bf16 only at the MXU operands.
        for k in range(9):
            dy, dx = k // 3, k % 3
            s = (dy - 1) * Wp + (dx - 1)
            col_ref[k * C:(k + 1) * C, :] = src_ref[:, M + s:M + s + P]
        return jnp.dot(w_ref[...], col_ref[...].astype(jnp.bfloat16),
                       preferred_element_type=jnp.float32)       # (C, P) f32

    def inst_norm(y):
        # Two-pass, interior-masked statistics in f32 (ring values are junk).
        mean = jnp.sum(y * m_in, axis=1, keepdims=True) * inv_hw
        cent = (y - mean) * m_in
        var = jnp.sum(cent * cent, axis=1, keepdims=True) * inv_hw
        return (y - mean) * lax.rsqrt(var + EPS)

    # ---- conv1 + InstanceNorm + ReLU (bias cancelled by IN) -------------
    t = jnp.maximum(inst_norm(conv3x3(xp_ref, w1_ref)), 0.0)     # (C, P) f32

    # ---- ReflectionPad2d(1) of the intermediate, in the VMEM scratch ----
    zeros_m = jnp.zeros((C, M), jnp.float32)
    t_ref[:, 0:M] = zeros_m                  # keep margins finite & zero
    t_ref[:, M + P:M + P + M] = zeros_m
    t_ref[:, M:M + P] = t
    # padded row 0 := padded row 2 ; padded row H+1 := padded row H-1
    # (requires H, W >= 2, same as ReflectionPad2d(1) itself)
    t_ref[:, M:M + Wp] = t_ref[:, M + 2 * Wp:M + 3 * Wp]
    t_ref[:, M + (H + 1) * Wp:M + P] = t_ref[:, M + (H - 1) * Wp:M + H * Wp]
    # padded col 0 := padded col 2 ; padded col W+1 := padded col W-1
    t_cur = t_ref[:, M:M + P]
    t_fix = jnp.where(m_lft, t_ref[:, M + 2:M + 2 + P],
                      jnp.where(m_rgt, t_ref[:, M - 2:M - 2 + P], t_cur))
    t_ref[:, M:M + P] = t_fix

    # ---- conv2 + InstanceNorm (bias cancelled by IN) --------------------
    y2 = inst_norm(conv3x3(t_ref, w2_ref))                       # (C, P) f32

    # ---- residual add: f32 interior of the padded input -----------------
    out_ref[...] = xp_ref[:, M:M + P] + y2


def rk_forward(x_nchw, w1_oihw, b1, w2_oihw, b2):
    """x: (N, C, H, W) f32; weights in PyTorch OIHW layout; returns NCHW.

    b1/b2 are accepted for nn.Conv2d parity but unused: a per-channel conv
    bias is exactly cancelled by the following InstanceNorm2d(affine=False).
    """
    del b1, b2
    x = x_nchw.astype(jnp.float32)
    N, C, H, W = x.shape
    Hp, Wp = H + 2, W + 2
    P = Hp * Wp
    M = Wp + 1                               # max |tap shift| on the flat grid

    # Glue: reflection pad + flattening + zero lane margins stay in plain JAX.
    xp = jnp.pad(x, ((0, 0), (0, 0), (1, 1), (1, 1)), mode="reflect")
    xp_m = jnp.pad(xp.reshape(N, C, P), ((0, 0), (0, 0), (M, M)))

    def to_mat(w_oihw):
        # OIHW -> (c_out, dy, dx, c_in) -> (C, 9C); bf16 for the MXU.
        return (jnp.transpose(w_oihw, (0, 2, 3, 1))
                .reshape(C, 9 * C).astype(jnp.bfloat16))

    w1m, w2m = to_mat(w1_oihw), to_mat(w2_oihw)

    # Interior / ring-column masks on the flattened padded grid.
    r = jnp.arange(Hp, dtype=jnp.int32)[:, None]
    c = jnp.arange(Wp, dtype=jnp.int32)[None, :]
    interior = (r >= 1) & (r <= H) & (c >= 1) & (c <= W)
    left = jnp.broadcast_to(c == 0, (Hp, Wp))
    right = jnp.broadcast_to(c == Wp - 1, (Hp, Wp))
    masks = (jnp.stack([interior, left, right])
             .astype(jnp.float32).reshape(3, P))

    kernel = functools.partial(_rk_kernel, H=H, W=W)
    out_p = pl.pallas_call(
        kernel,
        out_shape=jax.ShapeDtypeStruct((N, C, P), jnp.float32),
        grid_spec=pltpu.PrefetchScalarGridSpec(
            num_scalar_prefetch=0,
            grid=(N,),                       # N=2: even -> both v7x cores busy
            in_specs=[
                pl.BlockSpec((None, C, P + 2 * M), lambda n: (n, 0, 0)),
                # TODO(synk): pipeline_mode=pl.Buffered(1) on the three
                # grid-invariant operands below for production C (avoids a
                # redundant double buffer); negligible at C=8.
                pl.BlockSpec((C, 9 * C), lambda n: (0, 0)),
                pl.BlockSpec((C, 9 * C), lambda n: (0, 0)),
                pl.BlockSpec((3, P), lambda n: (0, 0)),
            ],
            out_specs=pl.BlockSpec((None, C, P), lambda n: (n, 0, 0)),
            scratch_shapes=[
                pltpu.VMEM((9 * C, P), jnp.float32),        # shared im2col
                pltpu.VMEM((C, P + 2 * M), jnp.float32),    # padded intermediate
            ],
        ),
        compiler_params=pltpu.CompilerParams(
            dimension_semantics=("parallel",),
            # <= 50% of v7x's 64 MiB physical VMEM; ample on v5e/v6e as well.
            vmem_limit_bytes=32 * 1024 * 1024),
    )(xp_m, w1m, w2m, masks)

    return out_p.reshape(N, C, Hp, Wp)[:, :, 1:H + 1, 1:W + 1]


def _reference(x, w1, b1, w2, b2):
    """Pure-JAX NCHW reference mirroring kernel numerics (bf16 MXU operands,
    f32 accumulation / statistics).  Keeps the conv biases, so the comparison
    also validates that dropping them in the kernel is semantics-preserving."""
    def conv(h, w, b):
        hp = jnp.pad(h, ((0, 0), (0, 0), (1, 1), (1, 1)), mode="reflect")
        y = lax.conv_general_dilated(
            hp.astype(jnp.bfloat16), w.astype(jnp.bfloat16), (1, 1), "VALID",
            dimension_numbers=("NCHW", "OIHW", "NCHW"),
            preferred_element_type=jnp.float32)
        return y + b.reshape(1, -1, 1, 1)

    def inorm(y):
        m = jnp.mean(y, axis=(2, 3), keepdims=True)
        v = jnp.mean((y - m) ** 2, axis=(2, 3), keepdims=True)
        return (y - m) * lax.rsqrt(v + EPS)

    h = jnp.maximum(inorm(conv(x, w1, b1)), 0.0)
    h = inorm(conv(h, w2, b2))
    return x + h


if __name__ == "__main__":
    # Residual block requires in_ch == out_ch (true in the PyTorch module too).
    N, C, H, W = 2, 8, 16, 16

    key = jax.random.PRNGKey(0)
    k1, k2, k3, k4, k5 = jax.random.split(key, 5)
    x = jax.random.normal(k1, (N, C, H, W), jnp.float32)
    w1 = jax.random.normal(k2, (C, C, 3, 3), jnp.float32) * 0.1   # OIHW
    b1 = jax.random.normal(k3, (C,), jnp.float32) * 0.1
    w2 = jax.random.normal(k4, (C, C, 3, 3), jnp.float32) * 0.1
    b2 = jax.random.normal(k5, (C,), jnp.float32) * 0.1

    out = jax.block_until_ready(rk_forward(x, w1, b1, w2, b2))

    ref = _reference(x, w1, b1, w2, b2)
    np.testing.assert_allclose(np.asarray(out), np.asarray(ref),
                               rtol=1e-3, atol=1e-3)

    print("KERNEL_OK")
</pallas_src>

<mosaic_0001>
module attributes {stable_mosaic.version = 11 : i64} {
  func.func @_rk_kernel(%arg0: i32, %arg1: memref<1x8x362xf32, #tpu.memory_space<vmem>>, %arg2: memref<8x72xbf16, #tpu.memory_space<vmem>>, %arg3: memref<8x72xbf16, #tpu.memory_space<vmem>>, %arg4: memref<3x324xf32, #tpu.memory_space<vmem>>, %arg5: memref<1x8x324xf32, #tpu.memory_space<vmem>>, %arg6: memref<72x324xf32, #tpu.memory_space<vmem>>, %arg7: memref<8x362xf32, #tpu.memory_space<vmem>>) attributes {dimension_semantics = [#tpu.dimension_semantics<parallel>], iteration_bounds = array<i64: 2>, scalar_prefetch = 0 : i64, scratch_operands = 2 : i64, tpu.core_type = #tpu.core_type<tc>, window_params = [{transform_indices = @transform_0, window_bounds = array<i64: 1, 8, 362>}, {pipeline_mode = #tpu.pipeline_mode<synchronous>, transform_indices = @transform_1, window_bounds = array<i64: 8, 72>}, {pipeline_mode = #tpu.pipeline_mode<synchronous>, transform_indices = @transform_2, window_bounds = array<i64: 8, 72>}, {pipeline_mode = #tpu.pipeline_mode<synchronous>, transform_indices = @transform_3, window_bounds = array<i64: 3, 324>}, {transform_indices = @transform_4, window_bounds = array<i64: 1, 8, 324>}]} {
    %c0 = arith.constant 0 : index
    %c0_0 = arith.constant 0 : index
    %0 = vector.load %arg4[%c0, %c0_0] : memref<3x324xf32, #tpu.memory_space<vmem>>, vector<1x324xf32>
    %c1 = arith.constant 1 : index
    %c0_1 = arith.constant 0 : index
    %1 = vector.load %arg4[%c1, %c0_1] : memref<3x324xf32, #tpu.memory_space<vmem>>, vector<1x324xf32>
    %cst = arith.constant 5.000000e-01 : f32
    %2 = vector.broadcast %cst : f32 to vector<1x324xf32>
    %3 = arith.cmpf ogt, %1, %2 : vector<1x324xf32>
    %c2 = arith.constant 2 : index
    %c0_2 = arith.constant 0 : index
    %4 = vector.load %arg4[%c2, %c0_2] : memref<3x324xf32, #tpu.memory_space<vmem>>, vector<1x324xf32>
    %cst_3 = arith.constant 5.000000e-01 : f32
    %5 = vector.broadcast %cst_3 : f32 to vector<1x324xf32>
    %6 = arith.cmpf ogt, %4, %5 : vector<1x324xf32>
    %c0_4 = arith.constant 0 : index
    %c0_5 = arith.constant 0 : index
    %c0_6 = arith.constant 0 : index
    %7 = vector.load %arg1[%c0_4, %c0_5, %c0_6] : memref<1x8x362xf32, #tpu.memory_space<vmem>>, vector<1x8x324xf32>
    %8 = vector.shape_cast %7 : vector<1x8x324xf32> to vector<8x324xf32>
    %c0_7 = arith.constant 0 : index
    %c0_8 = arith.constant 0 : index
    %9 = vector.load %arg6[%c0_7, %c0_8] : memref<72x324xf32, #tpu.memory_space<vmem>>, vector<8x324xf32>
    tpu.vector_store %arg6[%c0_7, %c0_8], %8 {strides = array<i32>} : memref<72x324xf32, #tpu.memory_space<vmem>>, vector<8x324xf32>,
    %c0_9 = arith.constant 0 : index
    %c0_10 = arith.constant 0 : index
    %c1_11 = arith.constant 1 : index
    %10 = vector.load %arg1[%c0_9, %c0_10, %c1_11] : memref<1x8x362xf32, #tpu.memory_space<vmem>>, vector<1x8x324xf32>
    %11 = vector.shape_cast %10 : vector<1x8x324xf32> to vector<8x324xf32>
    %c8 = arith.constant 8 : index
    %c0_12 = arith.constant 0 : index
    %12 = vector.load %arg6[%c8, %c0_12] : memref<72x324xf32, #tpu.memory_space<vmem>>, vector<8x324xf32>
    tpu.vector_store %arg6[%c8, %c0_12], %11 {strides = array<i32>} : memref<72x324xf32, #tpu.memory_space<vmem>>, vector<8x324xf32>,
    %c0_13 = arith.constant 0 : index
    %c0_14 = arith.constant 0 : index
    %c2_15 = arith.constant 2 : index
    %13 = vector.load %arg1[%c0_13, %c0_14, %c2_15] : memref<1x8x362xf32, #tpu.memory_space<vmem>>, vector<1x8x324xf32>
    %14 = vector.shape_cast %13 : vector<1x8x324xf32> to vector<8x324xf32>
    %c16 = arith.constant 16 : index
    %c0_16 = arith.constant 0 : index
    %15 = vector.load %arg6[%c16, %c0_16] : memref<72x324xf32, #tpu.memory_space<vmem>>, vector<8x324xf32>
    tpu.vector_store %arg6[%c16, %c0_16], %14 {strides = array<i32>} : memref<72x324xf32, #tpu.memory_space<vmem>>, vector<8x324xf32>,
    %c0_17 = arith.constant 0 : index
    %c0_18 = arith.constant 0 : index
    %c18 = arith.constant 18 : index
    %16 = vector.load %arg1[%c0_17, %c0_18, %c18] : memref<1x8x362xf32, #tpu.memory_space<vmem>>, vector<1x8x324xf32>
    %17 = vector.shape_cast %16 : vector<1x8x324xf32> to vector<8x324xf32>
    %c24 = arith.constant 24 : index
    %c0_19 = arith.constant 0 : index
    %18 = vector.load %arg6[%c24, %c0_19] : memref<72x324xf32, #tpu.memory_space<vmem>>, vector<8x324xf32>
    tpu.vector_store %arg6[%c24, %c0_19], %17 {strides = array<i32>} : memref<72x324xf32, #tpu.memory_space<vmem>>, vector<8x324xf32>,
    %c0_20 = arith.constant 0 : index
    %c0_21 = arith.constant 0 : index
    %c19 = arith.constant 19 : index
    %19 = vector.load %arg1[%c0_20, %c0_21, %c19] : memref<1x8x362xf32, #tpu.memory_space<vmem>>, vector<1x8x324xf32>
    %20 = vector.shape_cast %19 : vector<1x8x324xf32> to vector<8x324xf32>
    %c32 = arith.constant 32 : index
    %c0_22 = arith.constant 0 : index
    %21 = vector.load %arg6[%c32, %c0_22] : memref<72x324xf32, #tpu.memory_space<vmem>>, vector<8x324xf32>
    tpu.vector_store %arg6[%c32, %c0_22], %20 {strides = array<i32>} : memref<72x324xf32, #tpu.memory_space<vmem>>, vector<8x324xf32>,
    %c0_23 = arith.constant 0 : index
    %c0_24 = arith.constant 0 : index
    %c20 = arith.constant 20 : index
    %22 = vector.load %arg1[%c0_23, %c0_24, %c20] : memref<1x8x362xf32, #tpu.memory_space<vmem>>, vector<1x8x324xf32>
    %23 = vector.shape_cast %22 : vector<1x8x324xf32> to vector<8x324xf32>
    %c40 = arith.constant 40 : index
    %c0_25 = arith.constant 0 : index
    %24 = vector.load %arg6[%c40, %c0_25] : memref<72x324xf32, #tpu.memory_space<vmem>>, vector<8x324xf32>
    tpu.vector_store %arg6[%c40, %c0_25], %23 {strides = array<i32>} : memref<72x324xf32, #tpu.memory_space<vmem>>, vector<8x324xf32>,
    %c0_26 = arith.constant 0 : index
    %c0_27 = arith.constant 0 : index
    %c36 = arith.constant 36 : index
    %25 = vector.load %arg1[%c0_26, %c0_27, %c36] : memref<1x8x362xf32, #tpu.memory_space<vmem>>, vector<1x8x324xf32>
    %26 = vector.shape_cast %25 : vector<1x8x324xf32> to vector<8x324xf32>
    %c48 = arith.constant 48 : index
    %c0_28 = arith.constant 0 : index
    %27 = vector.load %arg6[%c48, %c0_28] : memref<72x324xf32, #tpu.memory_space<vmem>>, vector<8x324xf32>
    tpu.vector_store %arg6[%c48, %c0_28], %26 {strides = array<i32>} : memref<72x324xf32, #tpu.memory_space<vmem>>, vector<8x324xf32>,
    %c0_29 = arith.constant 0 : index
    %c0_30 = arith.constant 0 : index
    %c37 = arith.constant 37 : index
    %28 = vector.load %arg1[%c0_29, %c0_30, %c37] : memref<1x8x362xf32, #tpu.memory_space<vmem>>, vector<1x8x324xf32>
    %29 = vector.shape_cast %28 : vector<1x8x324xf32> to vector<8x324xf32>
    %c56 = arith.constant 56 : index
    %c0_31 = arith.constant 0 : index
    %30 = vector.load %arg6[%c56, %c0_31] : memref<72x324xf32, #tpu.memory_space<vmem>>, vector<8x324xf32>
    tpu.vector_store %arg6[%c56, %c0_31], %29 {strides = array<i32>} : memref<72x324xf32, #tpu.memory_space<vmem>>, vector<8x324xf32>,
    %c0_32 = arith.constant 0 : index
    %c0_33 = arith.constant 0 : index
    %c38 = arith.constant 38 : index
    %31 = vector.load %arg1[%c0_32, %c0_33, %c38] : memref<1x8x362xf32, #tpu.memory_space<vmem>>, vector<1x8x324xf32>
    %32 = vector.shape_cast %31 : vector<1x8x324xf32> to vector<8x324xf32>
    %c64 = arith.constant 64 : index
    %c0_34 = arith.constant 0 : index
    %33 = vector.load %arg6[%c64, %c0_34] : memref<72x324xf32, #tpu.memory_space<vmem>>, vector<8x324xf32>
    tpu.vector_store %arg6[%c64, %c0_34], %32 {strides = array<i32>} : memref<72x324xf32, #tpu.memory_space<vmem>>, vector<8x324xf32>,
    %c0_35 = arith.constant 0 : index
    %c0_36 = arith.constant 0 : index
    %34 = vector.load %arg2[%c0_35, %c0_36] : memref<8x72xbf16, #tpu.memory_space<vmem>>, vector<8x72xbf16>
    %c0_37 = arith.constant 0 : index
    %c0_38 = arith.constant 0 : index
    %35 = vector.load %arg6[%c0_37, %c0_38] : memref<72x324xf32, #tpu.memory_space<vmem>>, vector<72x324xf32>
    %36 = arith.truncf %35 : vector<72x324xf32> to vector<72x324xbf16>
    %cst_39 = arith.constant dense<0.000000e+00> : vector<8x324xf32>
    %37 = tpu.matmul %34, %36, %cst_39 {dimension_numbers = #tpu.dot_dimension_numbers<[1], [0], [0], [1], [0, 0, 1, 1], [], []>} : vector<8x72xbf16>, vector<72x324xbf16>, vector<8x324xf32> -> vector<8x324xf32>
    %38 = vector.broadcast %0 : vector<1x324xf32> to vector<8x324xf32>
    %39 = arith.mulf %37, %38 : vector<8x324xf32>
    %cst_40 = arith.constant dense<0.000000e+00> : vector<8xf32>
    %40 = vector.multi_reduction <add>, %39, %cst_40 [1] : vector<8x324xf32> to vector<8xf32>
    %41 = vector.shape_cast %40 : vector<8xf32> to vector<8x1xf32>
    %cst_41 = arith.constant 3.906250e-03 : f32
    %42 = vector.broadcast %cst_41 : f32 to vector<8x1xf32>
    %43 = arith.mulf %41, %42 : vector<8x1xf32>
    %44 = vector.broadcast %43 : vector<8x1xf32> to vector<8x324xf32>
    %45 = arith.subf %37, %44 : vector<8x324xf32>
    %46 = vector.broadcast %0 : vector<1x324xf32> to vector<8x324xf32>
    %47 = arith.mulf %45, %46 : vector<8x324xf32>
    %48 = arith.mulf %47, %47 : vector<8x324xf32>
    %cst_42 = arith.constant dense<0.000000e+00> : vector<8xf32>
    %49 = vector.multi_reduction <add>, %48, %cst_42 [1] : vector<8x324xf32> to vector<8xf32>
    %50 = vector.shape_cast %49 : vector<8xf32> to vector<8x1xf32>
    %cst_43 = arith.constant 3.906250e-03 : f32
    %51 = vector.broadcast %cst_43 : f32 to vector<8x1xf32>
    %52 = arith.mulf %50, %51 : vector<8x1xf32>
    %53 = vector.broadcast %43 : vector<8x1xf32> to vector<8x324xf32>
    %54 = arith.subf %37, %53 : vector<8x324xf32>
    %cst_44 = arith.constant 9.99999974E-6 : f32
    %55 = vector.broadcast %cst_44 : f32 to vector<8x1xf32>
    %56 = arith.addf %52, %55 : vector<8x1xf32>
    %57 = math.rsqrt %56 : vector<8x1xf32>
    %58 = vector.broadcast %57 : vector<8x1xf32> to vector<8x324xf32>
    %59 = arith.mulf %54, %58 : vector<8x324xf32>
    %cst_45 = arith.constant 0.000000e+00 : f32
    %60 = vector.broadcast %cst_45 : f32 to vector<8x324xf32>
    %61 = arith.maximumf %59, %60 : vector<8x324xf32>
    %cst_46 = arith.constant 0.000000e+00 : f32
    %62 = vector.broadcast %cst_46 : f32 to vector<8x19xf32>
    %c0_47 = arith.constant 0 : index
    %c0_48 = arith.constant 0 : index
    %63 = vector.load %arg7[%c0_47, %c0_48] : memref<8x362xf32, #tpu.memory_space<vmem>>, vector<8x19xf32>
    tpu.vector_store %arg7[%c0_47, %c0_48], %62 {strides = array<i32>} : memref<8x362xf32, #tpu.memory_space<vmem>>, vector<8x19xf32>,
    %c0_49 = arith.constant 0 : index
    %c343 = arith.constant 343 : index
    %64 = vector.load %arg7[%c0_49, %c343] : memref<8x362xf32, #tpu.memory_space<vmem>>, vector<8x19xf32>
    tpu.vector_store %arg7[%c0_49, %c343], %62 {strides = array<i32>} : memref<8x362xf32, #tpu.memory_space<vmem>>, vector<8x19xf32>,
    %c0_50 = arith.constant 0 : index
    %c19_51 = arith.constant 19 : index
    %65 = vector.load %arg7[%c0_50, %c19_51] : memref<8x362xf32, #tpu.memory_space<vmem>>, vector<8x324xf32>
    tpu.vector_store %arg7[%c0_50, %c19_51], %61 {strides = array<i32>} : memref<8x362xf32, #tpu.memory_space<vmem>>, vector<8x324xf32>,
    %c0_52 = arith.constant 0 : index
    %c55 = arith.constant 55 : index
    %66 = vector.load %arg7[%c0_52, %c55] : memref<8x362xf32, #tpu.memory_space<vmem>>, vector<8x18xf32>
    %c0_53 = arith.constant 0 : index
    %c19_54 = arith.constant 19 : index
    %67 = vector.load %arg7[%c0_53, %c19_54] : memref<8x362xf32, #tpu.memory_space<vmem>>, vector<8x18xf32>
    tpu.vector_store %arg7[%c0_53, %c19_54], %66 {strides = array<i32>} : memref<8x362xf32, #tpu.memory_space<vmem>>, vector<8x18xf32>,
    %c0_55 = arith.constant 0 : index
    %c289 = arith.constant 289 : index
    %68 = vector.load %arg7[%c0_55, %c289] : memref<8x362xf32, #tpu.memory_space<vmem>>, vector<8x18xf32>
    %c0_56 = arith.constant 0 : index
    %c325 = arith.constant 325 : index
    %69 = vector.load %arg7[%c0_56, %c325] : memref<8x362xf32, #tpu.memory_space<vmem>>, vector<8x18xf32>
    tpu.vector_store %arg7[%c0_56, %c325], %68 {strides = array<i32>} : memref<8x362xf32, #tpu.memory_space<vmem>>, vector<8x18xf32>,
    %c0_57 = arith.constant 0 : index
    %c19_58 = arith.constant 19 : index
    %70 = vector.load %arg7[%c0_57, %c19_58] : memref<8x362xf32, #tpu.memory_space<vmem>>, vector<8x324xf32>
    %c0_59 = arith.constant 0 : index
    %c21 = arith.constant 21 : index
    %71 = vector.load %arg7[%c0_59, %c21] : memref<8x362xf32, #tpu.memory_space<vmem>>, vector<8x324xf32>
    %c0_60 = arith.constant 0 : index
    %c17 = arith.constant 17 : index
    %72 = vector.load %arg7[%c0_60, %c17] : memref<8x362xf32, #tpu.memory_space<vmem>>, vector<8x324xf32>
    %73 = vector.shape_cast %6 : vector<1x324xi1> to vector<1x324xi1>
    %74 = vector.broadcast %73 : vector<1x324xi1> to vector<8x324xi1>
    %75 = arith.select %74, %72, %70 : vector<8x324xi1>, vector<8x324xf32>
    %76 = vector.shape_cast %3 : vector<1x324xi1> to vector<1x324xi1>
    %77 = vector.broadcast %76 : vector<1x324xi1> to vector<8x324xi1>
    %78 = arith.select %77, %71, %75 : vector<8x324xi1>, vector<8x324xf32>
    %c0_61 = arith.constant 0 : index
    %c19_62 = arith.constant 19 : index
    %79 = vector.load %arg7[%c0_61, %c19_62] : memref<8x362xf32, #tpu.memory_space<vmem>>, vector<8x324xf32>
    tpu.vector_store %arg7[%c0_61, %c19_62], %78 {strides = array<i32>} : memref<8x362xf32, #tpu.memory_space<vmem>>, vector<8x324xf32>,
    %c0_63 = arith.constant 0 : index
    %c0_64 = arith.constant 0 : index
    %80 = vector.load %arg7[%c0_63, %c0_64] : memref<8x362xf32, #tpu.memory_space<vmem>>, vector<8x324xf32>
    %c0_65 = arith.constant 0 : index
    %c0_66 = arith.constant 0 : index
    %81 = vector.load %arg6[%c0_65, %c0_66] : memref<72x324xf32, #tpu.memory_space<vmem>>, vector<8x324xf32>
    tpu.vector_store %arg6[%c0_65, %c0_66], %80 {strides = array<i32>} : memref<72x324xf32, #tpu.memory_space<vmem>>, vector<8x324xf32>,
    %c0_67 = arith.constant 0 : index
    %c1_68 = arith.constant 1 : index
    %82 = vector.load %arg7[%c0_67, %c1_68] : memref<8x362xf32, #tpu.memory_space<vmem>>, vector<8x324xf32>
    %c8_69 = arith.constant 8 : index
    %c0_70 = arith.constant 0 : index
    %83 = vector.load %arg6[%c8_69, %c0_70] : memref<72x324xf32, #tpu.memory_space<vmem>>, vector<8x324xf32>
    tpu.vector_store %arg6[%c8_69, %c0_70], %82 {strides = array<i32>} : memref<72x324xf32, #tpu.memory_space<vmem>>, vector<8x324xf32>,
    %c0_71 = arith.constant 0 : index
    %c2_72 = arith.constant 2 : index
    %84 = vector.load %arg7[%c0_71, %c2_72] : memref<8x362xf32, #tpu.memory_space<vmem>>, vector<8x324xf32>
    %c16_73 = arith.constant 16 : index
    %c0_74 = arith.constant 0 : index
    %85 = vector.load %arg6[%c16_73, %c0_74] : memref<72x324xf32, #tpu.memory_space<vmem>>, vector<8x324xf32>
    tpu.vector_store %arg6[%c16_73, %c0_74], %84 {strides = array<i32>} : memref<72x324xf32, #tpu.memory_space<vmem>>, vector<8x324xf32>,
    %c0_75 = arith.constant 0 : index
    %c18_76 = arith.constant 18 : index
    %86 = vector.load %arg7[%c0_75, %c18_76] : memref<8x362xf32, #tpu.memory_space<vmem>>, vector<8x324xf32>
    %c24_77 = arith.constant 24 : index
    %c0_78 = arith.constant 0 : index
    %87 = vector.load %arg6[%c24_77, %c0_78] : memref<72x324xf32, #tpu.memory_space<vmem>>, vector<8x324xf32>
    tpu.vector_store %arg6[%c24_77, %c0_78], %86 {strides = array<i32>} : memref<72x324xf32, #tpu.memory_space<vmem>>, vector<8x324xf32>,
    %c0_79 = arith.constant 0 : index
    %c19_80 = arith.constant 19 : index
    %88 = vector.load %arg7[%c0_79, %c19_80] : memref<8x362xf32, #tpu.memory_space<vmem>>, vector<8x324xf32>
    %c32_81 = arith.constant 32 : index
    %c0_82 = arith.constant 0 : index
    %89 = vector.load %arg6[%c32_81, %c0_82] : memref<72x324xf32, #tpu.memory_space<vmem>>, vector<8x324xf32>
    tpu.vector_store %arg6[%c32_81, %c0_82], %88 {strides = array<i32>} : memref<72x324xf32, #tpu.memory_space<vmem>>, vector<8x324xf32>,
    %c0_83 = arith.constant 0 : index
    %c20_84 = arith.constant 20 : index
    %90 = vector.load %arg7[%c0_83, %c20_84] : memref<8x362xf32, #tpu.memory_space<vmem>>, vector<8x324xf32>
    %c40_85 = arith.constant 40 : index
    %c0_86 = arith.constant 0 : index
    %91 = vector.load %arg6[%c40_85, %c0_86] : memref<72x324xf32, #tpu.memory_space<vmem>>, vector<8x324xf32>
    tpu.vector_store %arg6[%c40_85, %c0_86], %90 {strides = array<i32>} : memref<72x324xf32, #tpu.memory_space<vmem>>, vector<8x324xf32>,
    %c0_87 = arith.constant 0 : index
    %c36_88 = arith.constant 36 : index
    %92 = vector.load %arg7[%c0_87, %c36_88] : memref<8x362xf32, #tpu.memory_space<vmem>>, vector<8x324xf32>
    %c48_89 = arith.constant 48 : index
    %c0_90 = arith.constant 0 : index
    %93 = vector.load %arg6[%c48_89, %c0_90] : memref<72x324xf32, #tpu.memory_space<vmem>>, vector<8x324xf32>
    tpu.vector_store %arg6[%c48_89, %c0_90], %92 {strides = array<i32>} : memref<72x324xf32, #tpu.memory_space<vmem>>, vector<8x324xf32>,
    %c0_91 = arith.constant 0 : index
    %c37_92 = arith.constant 37 : index
    %94 = vector.load %arg7[%c0_91, %c37_92] : memref<8x362xf32, #tpu.memory_space<vmem>>, vector<8x324xf32>
    %c56_93 = arith.constant 56 : index
    %c0_94 = arith.constant 0 : index
    %95 = vector.load %arg6[%c56_93, %c0_94] : memref<72x324xf32, #tpu.memory_space<vmem>>, vector<8x324xf32>
    tpu.vector_store %arg6[%c56_93, %c0_94], %94 {strides = array<i32>} : memref<72x324xf32, #tpu.memory_space<vmem>>, vector<8x324xf32>,
    %c0_95 = arith.constant 0 : index
    %c38_96 = arith.constant 38 : index
    %96 = vector.load %arg7[%c0_95, %c38_96] : memref<8x362xf32, #tpu.memory_space<vmem>>, vector<8x324xf32>
    %c64_97 = arith.constant 64 : index
    %c0_98 = arith.constant 0 : index
    %97 = vector.load %arg6[%c64_97, %c0_98] : memref<72x324xf32, #tpu.memory_space<vmem>>, vector<8x324xf32>
    tpu.vector_store %arg6[%c64_97, %c0_98], %96 {strides = array<i32>} : memref<72x324xf32, #tpu.memory_space<vmem>>, vector<8x324xf32>,
    %c0_99 = arith.constant 0 : index
    %c0_100 = arith.constant 0 : index
    %98 = vector.load %arg3[%c0_99, %c0_100] : memref<8x72xbf16, #tpu.memory_space<vmem>>, vector<8x72xbf16>
    %c0_101 = arith.constant 0 : index
    %c0_102 = arith.constant 0 : index
    %99 = vector.load %arg6[%c0_101, %c0_102] : memref<72x324xf32, #tpu.memory_space<vmem>>, vector<72x324xf32>
    %100 = arith.truncf %99 : vector<72x324xf32> to vector<72x324xbf16>
    %cst_103 = arith.constant dense<0.000000e+00> : vector<8x324xf32>
    %101 = tpu.matmul %98, %100, %cst_103 {dimension_numbers = #tpu.dot_dimension_numbers<[1], [0], [0], [1], [0, 0, 1, 1], [], []>} : vector<8x72xbf16>, vector<72x324xbf16>, vector<8x324xf32> -> vector<8x324xf32>
    %102 = vector.broadcast %0 : vector<1x324xf32> to vector<8x324xf32>
    %103 = arith.mulf %101, %102 : vector<8x324xf32>
    %cst_104 = arith.constant dense<0.000000e+00> : vector<8xf32>
    %104 = vector.multi_reduction <add>, %103, %cst_104 [1] : vector<8x324xf32> to vector<8xf32>
    %105 = vector.shape_cast %104 : vector<8xf32> to vector<8x1xf32>
    %cst_105 = arith.constant 3.906250e-03 : f32
    %106 = vector.broadcast %cst_105 : f32 to vector<8x1xf32>
    %107 = arith.mulf %105, %106 : vector<8x1xf32>
    %108 = vector.broadcast %107 : vector<8x1xf32> to vector<8x324xf32>
    %109 = arith.subf %101, %108 : vector<8x324xf32>
    %110 = vector.broadcast %0 : vector<1x324xf32> to vector<8x324xf32>
    %111 = arith.mulf %109, %110 : vector<8x324xf32>
    %112 = arith.mulf %111, %111 : vector<8x324xf32>
    %cst_106 = arith.constant dense<0.000000e+00> : vector<8xf32>
    %113 = vector.multi_reduction <add>, %112, %cst_106 [1] : vector<8x324xf32> to vector<8xf32>
    %114 = vector.shape_cast %113 : vector<8xf32> to vector<8x1xf32>
    %cst_107 = arith.constant 3.906250e-03 : f32
    %115 = vector.broadcast %cst_107 : f32 to vector<8x1xf32>
    %116 = arith.mulf %114, %115 : vector<8x1xf32>
    %117 = vector.broadcast %107 : vector<8x1xf32> to vector<8x324xf32>
    %118 = arith.subf %101, %117 : vector<8x324xf32>
    %cst_108 = arith.constant 9.99999974E-6 : f32
    %119 = vector.broadcast %cst_108 : f32 to vector<8x1xf32>
    %120 = arith.addf %116, %119 : vector<8x1xf32>
    %121 = math.rsqrt %120 : vector<8x1xf32>
    %122 = vector.broadcast %121 : vector<8x1xf32> to vector<8x324xf32>
    %123 = arith.mulf %118, %122 : vector<8x324xf32>
    %c0_109 = arith.constant 0 : index
    %c0_110 = arith.constant 0 : index
    %c19_111 = arith.constant 19 : index
    %124 = vector.load %arg1[%c0_109, %c0_110, %c19_111] : memref<1x8x362xf32, #tpu.memory_space<vmem>>, vector<1x8x324xf32>
    %125 = vector.shape_cast %124 : vector<1x8x324xf32> to vector<8x324xf32>
    %126 = arith.addf %125, %123 : vector<8x324xf32>
    %c0_112 = arith.constant 0 : index
    %c0_113 = arith.constant 0 : index
    %c0_114 = arith.constant 0 : index
    %127 = vector.load %arg5[%c0_112, %c0_113, %c0_114] : memref<1x8x324xf32, #tpu.memory_space<vmem>>, vector<1x8x324xf32>
    %128 = vector.shape_cast %127 : vector<1x8x324xf32> to vector<8x324xf32>
    %129 = vector.shape_cast %126 : vector<8x324xf32> to vector<1x8x324xf32>
    tpu.vector_store %arg5[%c0_112, %c0_113, %c0_114], %129 {strides = array<i32>} : memref<1x8x324xf32, #tpu.memory_space<vmem>>, vector<1x8x324xf32>,
    return
  }
  func.func @transform_0(%arg0: i32) -> (i32, i32, i32) {
    %c0_i32 = arith.constant 0 : i32
    %c0_i32_0 = arith.constant 0 : i32
    %c0_i32_1 = arith.constant 0 : i32
    return %arg0, %c0_i32, %c0_i32_0 : i32, i32, i32
  }
  func.func @transform_1(%arg0: i32) -> (i32, i32) {
    %c0_i32 = arith.constant 0 : i32
    %c0_i32_0 = arith.constant 0 : i32
    %c0_i32_1 = arith.constant 0 : i32
    return %c0_i32, %c0_i32_0 : i32, i32
  }
  func.func @transform_2(%arg0: i32) -> (i32, i32) {
    %c0_i32 = arith.constant 0 : i32
    %c0_i32_0 = arith.constant 0 : i32
    %c0_i32_1 = arith.constant 0 : i32
    return %c0_i32, %c0_i32_0 : i32, i32
  }
  func.func @transform_3(%arg0: i32) -> (i32, i32) {
    %c0_i32 = arith.constant 0 : i32
    %c0_i32_0 = arith.constant 0 : i32
    %c0_i32_1 = arith.constant 0 : i32
    return %c0_i32, %c0_i32_0 : i32, i32
  }
  func.func @transform_4(%arg0: i32) -> (i32, i32, i32) {
    %c0_i32 = arith.constant 0 : i32
    %c0_i32_0 = arith.constant 0 : i32
    %c0_i32_1 = arith.constant 0 : i32
    return %arg0, %c0_i32, %c0_i32_0 : i32, i32, i32
  }
}

</mosaic_0001>

<bundles_post_ra>
// kernel: tpu_custom_call.1
= control target key start
LH: loop header
LB: loop body
LE: loop exit
PB: predicated region body
PF: predicated region fallthrough
CT: control target
= control target key end

     0   :  { %9 = vsyncpa [#allocation5], 0  ;;  %s2074_s0 = inlined_call_operand.hbm [shape: f32[2,8,362], index: 0, kind: input, shape index: {}]   ;;  %s2075_s1 = inlined_call_operand.hbm [shape: bf16[8,72], index: 1, kind: input, shape index: {}]   ;;  %s2076_s2 = inlined_call_operand.hbm [shape: bf16[8,72], index: 2, kind: input, shape index: {}]   ;;  %s2077_s3 = inlined_call_operand.hbm [shape: f32[3,324], index: 3, kind: input, shape index: {}]   ;;  %s2078_s4 = inlined_call_operand.hbm [shape: f32[2,8,324], index: 4, kind: output, shape index: {}]  }
   0x1   :  { %11 = vsyncpa [#allocation5 + $0x1], 0 }
   0x2   :  { %12 = vsyncpa [#allocation8], 0 }
   0x3   :  { %13 = vsyncpa [#allocation11], 0 }
   0x4   :  { %14 = vsyncpa [#allocation6], 0 }
   0x5   :  { %16 = vsyncpa [#allocation6 + $0x1], 0  ;;  %s1621_s15 = smov 0   ;;  %s1623_s16 = smov 0  }
   0x6   :  { %s1625_s17 = smov 0   ;;  %s1627_s18 = smov 0  }
   0x7 LB: > { %s1642_s19 = sadd.s32 4294967295, %s1574_s18   ;;  %s1236_s20 = sadd.s32 4294967294, %s1574_s18   ;;  %s1574_s18 = sphi %s1627_s18, %s2120_s18   ;;  %s1570_s17 = sphi %s1625_s17, %s2119_s17   ;;  %s1566_s16 = sphi %s1623_s16, %s2118_s16   ;;  %s1562_s15 = sphi %s1621_s15, %s2117_s15  }
   0x8   : > { %p42_p0 = scmp.ne.s32.totalorder %s1566_s16, %s1562_s15  ;;  %p2079_p1 = scmp.eq.s32.totalorder %s1642_s19, 0 }
   0x9   : > { %p135_p3 = scmp.eq.s32.totalorder %s1236_s20, 1  ;;  %p1237_p5 = scmp.ge.s32.totalorder %s1574_s18, 1 }
   0xa   : > { %p1651_p4 = por %p2079_p1, %p42_p0  ;;  %p142_p7 = scmp.lt.s32.totalorder %s1574_s18, 3 }
   0xb   : > { %p1656_p6 = por %p135_p3, %p42_p0  ;;  %s1576_s24 = smov [#allocation7]  }
   0xc   : > { %s2089_s21 = scalar_select %p1651_p4, 1, 0 }
   0xd   : > { %s2090_s22 = scalar_select %p1656_p6, 1, 0 }
   0xe   : > { %p1661_p8 = pnand %p1237_p5, %p142_p7  ;;  %s155_s25 = sshll.u32 %s1576_s24, 4  ;;  %s156_s25 = int_to_ptr.vmem [resolvable:$true] %s155_s25 }
   0xf   : > { %s1577_s26 = smov [#allocation9]   ;;  %s1578_s29 = smov [#allocation10]  }
  0x10   : > { %s2091_s23 = scalar_select %p1661_p8, 1, 0 }
  0x11   : > { %p1316_p10 = pneg %p1661_p8  ;;  %s166_s27 = sshll.u32 %s1577_s26, 4  ;;  %s167_s27 = int_to_ptr.vmem [resolvable:$true] %s166_s27 }
  0x12   : > { %s177_s30 = sshll.u32 %s1578_s29, 4  ;;  %s1407_s5 = scalar_lea.vmem %s156_s25, 64  ;;  %s1674_s30 = int_to_ptr.vmem [resolvable:$true] %s177_s30 }
  0x13   : > { %p1670_p11 = pnand %p1316_p10, %p2079_p1  ;;  %p1408_p13 = scmp.ne.s32.totalorder %s156_s25, %s1407_s5 }
  0x14   : > { %p1415_p5 = scmp.lt.s32.totalorder %s156_s25, %s156_s25  ;;  %p1416_p7 = scmp.lt.s32.totalorder %s1407_s5, %s1407_s5 }
  0x15   : > { %p1398_p12 = pneg %p1670_p11 }
  0x16   : > { %p1417_p10 = por %p1416_p7, %p1415_p5 }
  0x17   : > { %p1410_p0 = pnand %p1408_p13, %p1398_p12 }
  0x19   : > { %p1411_p3 = pneg %p1410_p0 }
  0x1b   : > { %p1418_p9 = pnand %p1417_p10, %p1411_p3 }
  0x1d   : > { %1421 = shalt.err (!%p1418_p9)
}
  0x1e   : > { %1319 = dma.hbm_to_vmem [thread:$0]  (!%p1670_p11), %s2075_s1, 64, %s156_s25, [#allocation8]  }
  0x1f   : > { %s1433_s8 = scalar_lea.vmem %s167_s27, 64  ;;  %p1441_p13 = scmp.lt.s32.totalorder %s167_s27, %s167_s27 }
  0x20   : > { %p1434_p1 = scmp.ne.s32.totalorder %s167_s27, %s1433_s8  ;;  %p1442_p0 = scmp.lt.s32.totalorder %s1433_s8, %s1433_s8 }
  0x22   : > { %p1436_p2 = pnand %p1434_p1, %p1398_p12  ;;  %p1443_p4 = por %p1442_p0, %p1441_p13 }
  0x24   : > { %p1437_p6 = pneg %p1436_p2 }
  0x26   : > { %p1444_p8 = pnand %p1443_p4, %p1437_p6 }
  0x28   : > { %1447 = shalt.err (!%p1444_p8)
}
  0x29   : > { %1322 = dma.hbm_to_vmem [thread:$0]  (!%p1670_p11), %s2076_s2, 64, %s167_s27, [#allocation8]  }
  0x2a   : > { %s1459_s11 = scalar_lea.vmem %s1674_s30, 192  ;;  %p1467_p3 = scmp.lt.s32.totalorder %s1674_s30, %s1674_s30 }
  0x2b   : > { %p1460_p9 = scmp.ne.s32.totalorder %s1674_s30, %s1459_s11  ;;  %p1468_p4 = scmp.lt.s32.totalorder %s1459_s11, %s1459_s11 }
  0x2d   : > { %p1462_p1 = pnand %p1460_p9, %p1398_p12  ;;  %p1469_p6 = por %p1468_p4, %p1467_p3 }
  0x2f   : > { %p1463_p2 = pneg %p1462_p1 }
  0x31   : > { %p1470_p8 = pnand %p1469_p6, %p1463_p2 }
  0x33   : > { %1473 = shalt.err (!%p1470_p8)
}
  0x34   : > { %1325 = dma.hbm_to_vmem [thread:$0]  (!%p1670_p11), %s2077_s3, 192, %s1674_s30, [#allocation11]  }
  0x35   : > { %s1708_s14 = sadd.s32 1, %s1574_s18   ;;  %s29_s24 = sadd.s32 1, %s1570_s17 }
  0x36   : > { %s26_s20 = ssub.s32 %s1574_s18, %s1708_s14  ;;  %p36_p5 = scmp.ne.s32.totalorder %s1570_s17, %s1566_s16 }
  0x37   : > { %p27_p12 = scmp.eq.s32.totalorder %s26_s20, 0  ;;  %p37_p7 = scmp.eq.s32.totalorder %s1574_s18, 0 }
  0x38   : > { %p1337_p10 = scmp.lt.s32.totalorder %s1574_s18, 2  ;;  %p2093_p0 = scmp.eq.s32.totalorder %s1642_s19, 1 }
  0x39   : > { %s1718_s25 = scalar_select %p27_p12, %s1570_s17, %s29_s24  }
  0x3a   : > { %p38_p13 = por %p37_p7, %p36_p5  ;;  %p1722_p9 = por %p2093_p0, %p36_p5 }
  0x3b   : > { %s188_s27 = sand.u32 1, %s1570_s17   ;;  %s1297_s28 = smul.u32 384, %s1574_s18 }
  0x3c   : > { %s2094_s26 = scalar_select %p1722_p9, 1, 0 }
  0x3d   : > { %s1296_s29 = smul.u32 24, %s188_s27  ;;  %p1728_p11 = pnand %p1337_p10, %p38_p13 }
  0x3e   : > { %s1735_s7 = scalar_lea.hbm %s2074_s0, %s1297_s28  ;;  %s189_s10 = scalar_lea.sflag [#allocation5], %s188_s27 }
  0x3f   : > { %s192_s8 = scalar_lea.vmem [#allocation4], %s1296_s29  ;;  %s1474_s11 = scalar_lea.hbm %s1735_s7, 384 }
  0x40   : > { %s200_s9 = sshll.u32 %s192_s8, 4  ;;  %p1475_p1 = scmp.ne.s32.totalorder %s1735_s7, %s1474_s11  ;;  %s201_s9 = int_to_ptr.vmem [resolvable:$true] %s200_s9 }
  0x41   : > { %p1476_p2 = pneg %p1728_p11  ;;  %s1479_s20 = scalar_lea.hbm %s2074_s0, 768 }
  0x42   : > { %p1480_p6 = scmp.lt.s32.totalorder %s1735_s7, %s2074_s0  ;;  %p1481_p8 = scmp.lt.s32.totalorder %s1479_s20, %s1474_s11 }
  0x43   : > { %p1477_p3 = pnand %p1476_p2, %p1475_p1 }
  0x44   : > { %p1482_p12 = por %p1481_p8, %p1480_p6 }
  0x45   : > { %p1478_p4 = pneg %p1477_p3 }
  0x47   : > { %p1483_p5 = pnand %p1482_p12, %p1478_p4 }
  0x49   : > { %1486 = shalt.err (!%p1483_p5)
}
  0x4a   : > { %s1487_s29 = scalar_lea.vmem %s201_s9, 384  ;;  %s1579_s27 = smov [#allocation4]  }
  0x4b   : > { %p1488_p7 = scmp.ne.s32.totalorder %s201_s9, %s1487_s29  ;;  %s1492_s5 = sshll.u32 %s1579_s27, 4  ;;  %s1493_s5 = int_to_ptr.vmem [resolvable:$false] %s1492_s5 }
  0x4c   : > { %s1494_s6 = scalar_lea.vmem %s1493_s5, 768  ;;  %p1495_p0 = scmp.lt.s32.totalorder %s201_s9, %s1493_s5 }
  0x4d   : > { %p1490_p10 = pnand %p1488_p7, %p1476_p2  ;;  %p1496_p1 = scmp.lt.s32.totalorder %s1494_s6, %s1487_s29 }
  0x4f   : > { %p1491_p13 = pneg %p1490_p10  ;;  %p1497_p3 = por %p1496_p1, %p1495_p0 }
  0x51   : > { %p1498_p9 = pnand %p1497_p3, %p1491_p13 }
  0x53   : > { %1501 = shalt.err (!%p1498_p9)
}
  0x54   : > { %1329 = dma.hbm_to_vmem [thread:$0]  (!%p1728_p11), %s1735_s7, 384, %s201_s9, %s189_s10  }
  0x55   : > { %p2096_p4 = scmp.ne.s32.totalorder %s2091_s23, 0 }
  0x56   : > { %s1754_s8 = sand.u32 (!%p2096_p4), 1, %s1566_s16   ;;  %p2097_p9 = scmp.ne.s32.totalorder (!%p2096_p4), %s2089_s21, 0 }
  0x57   : > { %209 = sbr.rel (%p2096_p4) target bundleno = 2209 (0x8a1), region = 36  ;;  %s212_s12 = scalar_lea.sflag (!%p2096_p4), [#allocation5], %s1754_s8 }
  0x58   : > { %s1298_s11 = smul.u32 (!%p2096_p4), 24, %s1754_s8 }
  0x5a   : > { %s1760_s13 = scalar_lea.vmem (!%p2096_p4), [#allocation4], %s1298_s11 }
  0x5c   : > { %1545 = dma.done.wait (%p2097_p9), %s212_s12, 384  }
  0x5d   : > { %1547 = vsyncadd (%p2097_p9), %s212_s12, 4294966912  ;;  %p2098_p11 = scmp.eq.s32.totalorder %s1642_s19, 0 }
  0x5f   : > { %1549 = dma.done.wait (%p2098_p11), [#allocation8], 128   ;;  %p2099_p2 = pmov %p2098_p11 }
  0x61   : > { %1551 = vsyncadd (%p2099_p2), [#allocation8], 4294967168  ;;  %p2100_p6 = pmov %p2099_p2 }
  0x62   : > { %p2101_p8 = pmov %p2099_p2 }
  0x63   : > { %1553 = dma.done.wait (%p2100_p6), [#allocation11], 192  }
  0x64   : > { %1555 = vsyncadd (%p2101_p8), [#allocation11], 4294967104  ;;  %v1580_v0 = vmov 0.0   ;;  %v416_v1 = vld [vmem:[%s1760_s13 + $0x10] sm:$0xff]  ;;  %v1777_v2 = vld [vmem:[%s1760_s13] sm:$0xff]  ;;  %vm265_vm0 = vcmask 556032  }
  0x65   : > { %1268 = vmatprep.subr.bf16.mxu1 %v1580_v0  ;;  %s1581_s21 = smov 90   ;;  %266 = vst.msk [vmem:[#allocation2 + $0x10] sm:$0xff] %vm265_vm0, %v416_v1  ;;  %v1784_v3 = vld [vmem:[%s1760_s13 + $0x8] sm:$0xff]  ;;  %s1582_s23 = smov 92   ;;  %v1588_v4 = vmov 0   ;;  %vm1590_vm1 = vmmov 0  }
  0x66   : > { %424 = vrot.lane.b32.xlu1 %v416_v1, %s1581_s21  ;;  %420 = vrot.lane.b32.xlu0 %v1777_v2, %s1581_s21  ;;  %s1583_s30 = smov 91   ;;  %s1584_s7 = smov 109   ;;  %vm426_vm2 = vcmask 736256   ;;  %vm482_vm3 = vcmask 1043456   ;;  %vm384_vm4 = vcmask 752640   ;;  %vm2088_vm5 = vcmask 744448  }
  0x67   : > { %s1585_s9 = smov 108   ;;  %s1586_s10 = smov 126   ;;  %524 = vmatprep.mubr.bf16.mxu0 %v1588_v4  ;;  %1278 = vmatprep.mubr.msk.bf16.mxu1 %vm1590_vm1, %v1580_v0  ;;  %vm342_vm6 = vcmask 891904   ;;  %vm2087_vm7 = vcmask 883712   ;;  %vm2086_vm8 = vcmask 1031168   ;;  %vm2085_vm9 = vcmask 900096  }
  0x68   : > { %s1587_s20 = smov 110   ;;  %s1589_s24 = smov 127   ;;  %vm2084_vm10 = vcmask 1039360   ;;  %vm2083_vm11 = vcmask 588800   ;;  %vm621_vm12 = vcmask 154624   ;;  %vm623_vm13 = vcmask 868024  }
  0x69   : > { %624 = vst.msk [vmem:[#allocation3 + $0x10] sm:$0xff] %vm623_vm13, %v1580_v0  ;;  %s1591_s28 = smov 19   ;;  %vm642_vm14 = vcmask 711680   ;;  %vm639_vm15 = vcmask 1047704   ;;  %s1592_s29 = smov 36   ;;  %vm649_vm13 = vcmask 302232  }
  0x6a   : > { %422 = vrot.lane.b32.xlu0 %v1784_v3, %s1581_s21  ;;  %380 = vrot.lane.b32.xlu1 %v1784_v3, %s1582_s23  ;;  %622 = vst.msk [vmem:[#allocation3] sm:$0xff] %vm621_vm12, %v1580_v0  ;;  %s1593_s27 = smov 111   ;;  %s1594_s5 = smov 107  }
  0x6b   : > { %s1299_s6 = smul.u32 384, %s1642_s19  ;;  %s251_s12 = scalar_lea.vmem [#allocation12], %s1298_s11 }
  0x6c   : > { %s1123_s19 = scalar_lea.sflag [#allocation6], %s1754_s8  ;;  %p2114_p5 = scmp.ne.s32.totalorder %s2094_s26, 0 }
  0x6e   : > { %382 = vrot.lane.b32.xlu0 %v416_v1, %s1582_s23  ;;  %401 = vrot.lane.b32.xlu1 %v1784_v3, %s1583_s30 }
  0x72   : > { %403 = vrot.lane.b32.xlu0 %v416_v1, %s1583_s30  ;;  %378 = vrot.lane.b32.xlu1 %v1777_v2, %s1582_s23 }
  0x76   : > { %399 = vrot.lane.b32.xlu0 %v1777_v2, %s1583_s30  ;;  %338 = vrot.lane.b32.xlu1 %v1784_v3, %s1584_s7 }
  0x7a   : > { %340 = vrot.lane.b32.xlu0 %v416_v1, %s1584_s7  ;;  %359 = vrot.lane.b32.xlu1 %v1784_v3, %s1585_s9 }
  0x7e   : > { %361 = vrot.lane.b32.xlu0 %v416_v1, %s1585_s9  ;;  %336 = vrot.lane.b32.xlu1 %v1777_v2, %s1584_s7 }
  0x82   : > { %357 = vrot.lane.b32.xlu0 %v1777_v2, %s1585_s9  ;;  %296 = vrot.lane.b32.xlu1 %v1784_v3, %s1586_s10 }
  0x86   : > { %298 = vrot.lane.b32.xlu0 %v416_v1, %s1586_s10  ;;  %317 = vrot.lane.b32.xlu1 %v1784_v3, %s1587_s20 }
  0x8a   : > { %319 = vrot.lane.b32.xlu0 %v416_v1, %s1587_s20  ;;  %294 = vrot.lane.b32.xlu1 %v1777_v2, %s1586_s10 }
  0x8e   : > { %315 = vrot.lane.b32.xlu0 %v1777_v2, %s1587_s20  ;;  %275 = vrot.lane.b32.xlu1 %v1784_v3, %s1589_s24 }
  0x92   : > { %277 = vrot.lane.b32.xlu0 %v416_v1, %s1589_s24  ;;  %273 = vrot.lane.b32.xlu1 %v1777_v2, %s1589_s24 }
  0xd8   : > { %v425_v5 = vpop.permute.xlu1 %424  ;;  %v421_v6 = vpop.permute.xlu0 %420 }
  0xd9   : > { %434 = vst.msk [vmem:[#allocation2 + $0xd0] sm:$0xff] %vm265_vm0, %v425_v5 }
  0xdc   : > { %v423_v7 = vpop.permute.xlu0 %422  ;;  %v381_v8 = vpop.permute.xlu1 %380 }
  0xdd   : > { %v427_v9 = vsel %vm426_vm2, %v421_v6, %v423_v7  ;;  %v428_v10 = vsel %vm426_vm2, %v423_v7, %v425_v5 }
  0xde   : > { %v476_v11 = vpack.c.bf16 %v428_v10, %v428_v10  ;;  %v475_v12 = vpack.c.bf16 %v427_v9, %v427_v9  ;;  %v438_v9 = vld [vmem:[#allocation2 + $0x10] sm:$0xff] }
  0xe0   : > { %v383_v13 = vpop.permute.xlu0 %382  ;;  %v402_v14 = vpop.permute.xlu1 %401  ;;  %v462_v15 = vld [vmem:[#allocation2 + $0xd0] sm:$0xff]  ;;  %1247 = vmatprep.subr.msk.bf16.mxu0 %vm482_vm3, %v476_v11  ;;  %v484_v16 = vsel %vm482_vm3, %v475_v12, 0 }
  0xe1   : > { %392 = vst.msk [vmem:[#allocation2 + $0xa0] sm:$0xff] %vm265_vm0, %v383_v13  ;;  %v477_v17 = vpack.c.bf16 %v462_v15, %v462_v15  ;;  %499 = vmatpush1.bf16.msra.mxu0 %v484_v16  ;;  %v386_v21 = vsel %vm384_vm4, %v381_v8, %v383_v13 }
  0xe3   : > { %v490_v18 = vsel %vm482_vm3, %v477_v17, 0 }
  0xe4   : > { %v404_v19 = vpop.permute.xlu0 %403  ;;  %v379_v20 = vpop.permute.xlu1 %378  ;;  %1269 = vmatpush3.bf16.msra.mxu1 %v490_v18 }
  0xe5   : > { %v407_v22 = vsel %vm2088_vm5, %v402_v14, %v404_v19  ;;  %413 = vst.msk [vmem:[#allocation2 + $0xb8] sm:$0xff] %vm265_vm0, %v404_v19  ;;  %1270 = vmatprep.subr.bf16.mxu1 %v1580_v0  ;;  %v385_v26 = vsel %vm384_vm4, %v379_v20, %v381_v8  ;;  %v435_v8 = vld [vmem:[#allocation7] sm:$0xf] }
  0xe6   : > { %v473_v23 = vpack.c.bf16 %v407_v22, %v386_v21 }
  0xe8   : > { %v400_v24 = vpop.permute.xlu0 %399  ;;  %v339_v25 = vpop.permute.xlu1 %338  ;;  %500 = vmatprep.subr.bf16.mxu0 %v473_v23  ;;  %v456_v31 = vld [vmem:[#allocation2 + $0xa0] sm:$0xff] }
  0xe9   : > { %v406_v27 = vsel %vm2088_vm5, %v400_v24, %v402_v14  ;;  %v253_v14 = vld [vmem:[#allocation10] ss:$4 sm:$0x7] }
  0xea   : > { %v472_v28 = vpack.c.bf16 %v406_v27, %v385_v26 }
  0xec   : > { %v341_v29 = vpop.permute.xlu0 %340  ;;  %v360_v30 = vpop.permute.xlu1 %359  ;;  %v459_v32 = vld [vmem:[#allocation2 + $0xb8] sm:$0xff]  ;;  %501 = vmatpush1.bf16.msra.mxu0 %v472_v28 }
  0xed   : > { %350 = vst.msk [vmem:[#allocation2 + $0x70] sm:$0xff] %vm265_vm0, %v341_v29  ;;  %v474_v33 = vpack.c.bf16 %v459_v32, %v456_v31  ;;  %v344_v36 = vsel %vm342_vm6, %v339_v25, %v341_v29 }
  0xef   : > { %1271 = vmatpush3.bf16.msra.mxu1 %v474_v33 }
  0xf0   : > { %v362_v34 = vpop.permute.xlu0 %361  ;;  %v337_v35 = vpop.permute.xlu1 %336  ;;  %1272 = vmatprep.subr.bf16.mxu1 %v1580_v0 }
  0xf1   : > { %v365_v37 = vsel %vm2087_vm7, %v360_v30, %v362_v34  ;;  %371 = vst.msk [vmem:[#allocation2 + $0x88] sm:$0xff] %vm265_vm0, %v362_v34  ;;  %v343_v41 = vsel %vm342_vm6, %v337_v35, %v339_v25 }
  0xf2   : > { %v470_v38 = vpack.c.bf16 %v365_v37, %v344_v36 }
  0xf4   : > { %v358_v39 = vpop.permute.xlu0 %357  ;;  %v297_v40 = vpop.permute.xlu1 %296  ;;  %502 = vmatprep.subr.bf16.mxu0 %v470_v38  ;;  %v450_v46 = vld [vmem:[#allocation2 + $0x70] sm:$0xff] }
  0xf5   : > { %v364_v42 = vsel %vm2087_vm7, %v358_v39, %v360_v30 }
  0xf6   : > { %v469_v43 = vpack.c.bf16 %v364_v42, %v343_v41 }
  0xf8   : > { %v299_v44 = vpop.permute.xlu0 %298  ;;  %v318_v45 = vpop.permute.xlu1 %317  ;;  %v453_v47 = vld [vmem:[#allocation2 + $0x88] sm:$0xff]  ;;  %503 = vmatpush1.bf16.msra.mxu0 %v469_v43 }
  0xf9   : > { %308 = vst.msk [vmem:[#allocation2 + $0x40] sm:$0xff] %vm265_vm0, %v299_v44  ;;  %v471_v48 = vpack.c.bf16 %v453_v47, %v450_v46  ;;  %v302_v51 = vsel %vm2086_vm8, %v297_v40, %v299_v44 }
  0xfb   : > { %1273 = vmatpush3.bf16.msra.mxu1 %v471_v48 }
  0xfc   : > { %v320_v49 = vpop.permute.xlu0 %319  ;;  %v295_v50 = vpop.permute.xlu1 %294  ;;  %1274 = vmatprep.subr.bf16.mxu1 %v1580_v0 }
  0xfd   : > { %v323_v52 = vsel %vm2085_vm9, %v318_v45, %v320_v49  ;;  %329 = vst.msk [vmem:[#allocation2 + $0x58] sm:$0xff] %vm265_vm0, %v320_v49  ;;  %v301_v56 = vsel %vm2086_vm8, %v295_v50, %v297_v40 }
  0xfe   : > { %v467_v53 = vpack.c.bf16 %v323_v52, %v302_v51 }
 0x100   : > { %v316_v54 = vpop.permute.xlu0 %315  ;;  %v276_v55 = vpop.permute.xlu1 %275  ;;  %504 = vmatprep.subr.bf16.mxu0 %v467_v53  ;;  %v444_v61 = vld [vmem:[#allocation2 + $0x40] sm:$0xff] }
 0x101   : > { %v322_v57 = vsel %vm2085_vm9, %v316_v54, %v318_v45 }
 0x102   : > { %v466_v58 = vpack.c.bf16 %v322_v57, %v301_v56 }
 0x104   : > { %v278_v59 = vpop.permute.xlu0 %277  ;;  %v274_v60 = vpop.permute.xlu1 %273  ;;  %v447_v62 = vld [vmem:[#allocation2 + $0x58] sm:$0xff]  ;;  %505 = vmatpush1.bf16.msra.mxu0 %v466_v58 }
 0x105   : > { %v281_v63 = vsel %vm2084_vm10, %v276_v55, %v278_v59  ;;  %287 = vst.msk [vmem:[#allocation2 + $0x28] sm:$0xff] %vm265_vm0, %v278_v59  ;;  %v280_v1 = vsel %vm2084_vm10, %v274_v60, %v276_v55  ;;  %v468_v5 = vpack.c.bf16 %v447_v62, %v444_v61 }
 0x106   : > { %v464_v6 = vpack.c.bf16 %v281_v63, %v1784_v3  ;;  %v463_v7 = vpack.c.bf16 %v280_v1, %v1777_v2  ;;  %v574_v2 = vlaneseq }
 0x107   : > { %1275 = vmatpush3.bf16.msra.mxu1 %v468_v5 }
 0x108   : > { %1276 = vmatprep.subr.bf16.mxu1 %v1580_v0  ;;  %506 = vmatprep.subr.bf16.mxu0 %v464_v6  ;;  %v575_v3 = vshrl.u32 %v574_v2, 7 }
 0x109   : > { %507 = vmatpush1.bf16.msra.mxu0 %v463_v7 }
 0x10a   : > { %v1865_v12 = vsub.s32 0, %v575_v3  ;;  %v1867_v13 = vsub.s32 1, %v575_v3  ;;  %v1869_v15 = vsub.s32 2, %v575_v3 }
 0x10c   : > { %v441_v10 = vld [vmem:[#allocation2 + $0x28] sm:$0xff]  ;;  %1248 = vmatmul.mubr.msk.bf16.vlgmr.msra.gmra.mxu0 %vm2083_vm11, %v435_v8  ;;  %v1872_v17 = vrot.slane %v253_v14, %v1865_v12  ;;  %v1875_v18 = vrot.slane %v253_v14, %v1867_v13  ;;  %v1878_v20 = vrot.slane %v253_v14, %v1869_v15 }
 0x10d   : > { %v465_v11 = vpack.c.bf16 %v441_v10, %v438_v9  ;;  %1007 = vmatprep.mubr.bf16.mxu0 %v1588_v4  ;;  %v255_v9 = vld [vmem:[#allocation10 + $0x1] ss:$4 sm:$0x7] }
 0x10f   : > { %1277 = vmatpush3.bf16.msra.mxu1 %v465_v11 }
 0x110   : > { %1282 = vmatprep.subr.bf16.mxu1 %v1580_v0 }
 0x112   : > { %1279 = vmatmul.mubr.msk.bf16.vlgmr.msra.gmra.mxu1 %vm2083_vm11, %v435_v8  ;;  %v258_v8 = vld [vmem:[#allocation10 + $0x2] ss:$4 sm:$0x7] }
 0x113   : > { %1292 = vmatprep.mubr.msk.bf16.mxu1 %vm1590_vm1, %v1580_v0  ;;  %vm656_vm1 = vcmask 712232   ;;  %vm259_vm11 = vcmp.gt.f32.partialorder %v258_v8, 0.5 }
 0x114   : > { %v661_v2 = vsel %vm259_vm11, 1, %v1588_v4  ;;  %vm728_vm11 = vcmask 875520  }
 0x1cc   : > { %v526_v16 = vpop.f32.mrf.mxu0 }
 0x1cd   : > { %v589_v21 = vmul.f32 %v1872_v17, %v526_v16 }
 0x1ce   : > { %v528_v19 = vpop.f32.mrf.mxu0 }
 0x1cf   : > { %v590_v22 = vmul.f32 %v1875_v18, %v528_v19 }
 0x1d0   : > { %v530_v23 = vpop.f32.mrf.mxu0 }
 0x1d1   : > { %v592_v28 = vadd.f32 %v590_v22, %v589_v21 }
 0x1d2   : > { %v567_v24 = vpop.f32.mrf.mxu1  ;;  %v531_v25 = vpop.f32.mrf.mxu0 }
 0x1d3   : > { %v591_v26 = vmul.f32 %v1878_v20, %v567_v24  ;;  %v669_v25 = vrot.slane %v661_v2, %v1867_v13 }
 0x1d4   : > { %v1280_v27 = vpop.f32.mrf.mxu1 }
 0x1d5   : > { %v593_v29 = vsel %vm265_vm0, %v591_v26, 0.0  ;;  %vm675_vm8 = vcmp.eq.s32.totalorder %v669_v25, 1 }
 0x1d6   : > { %v570_v30 = vpop.f32.mrf.mxu1  ;;  %v594_v31 = vadd.f32 %v593_v29, %v592_v28 }
 0x1d8   : > { %v1281_v32 = vpop.f32.mrf.mxu1  ;;  %595 = vadd.xlane.f32.xlu0 %v594_v31 }
 0x261   : > { %v596_v33 = vpop.xlane.xlu0 %595 }
 0x262   : > { %v597_v34 = vmul.f32 0.00390625, %v596_v33 }
 0x264   : > { %v598_v35 = vsub.f32 %v526_v16, %v597_v34  ;;  %v599_v36 = vsub.f32 %v528_v19, %v597_v34  ;;  %v600_v37 = vsub.f32 %v567_v24, %v597_v34  ;;  %v665_v19 = vrot.slane %v661_v2, %v1865_v12 }
 0x265   : > { %v673_v24 = vrot.slane %v661_v2, %v1869_v15 }
 0x266   : > { %v601_v38 = vmul.f32 %v598_v35, %v1872_v17  ;;  %v602_v39 = vmul.f32 %v599_v36, %v1875_v18  ;;  %v603_v40 = vmul.f32 %v600_v37, %v1878_v20  ;;  %vm674_vm10 = vcmp.eq.s32.totalorder %v665_v19, 1 }
 0x267   : > { %vm676_vm9 = vcmp.eq.s32.totalorder %v673_v24, 1 }
 0x268   : > { %v604_v41 = vmul.f32 %v601_v38, %v601_v38  ;;  %v605_v42 = vmul.f32 %v602_v39, %v602_v39  ;;  %v606_v43 = vmul.f32 %v603_v40, %v603_v40 }
 0x26a   : > { %v607_v44 = vadd.f32 %v605_v42, %v604_v41  ;;  %v608_v45 = vsel %vm265_vm0, %v606_v43, 0.0 }
 0x26c   : > { %v609_v46 = vadd.f32 %v608_v45, %v607_v44 }
 0x26e   : > { %610 = vadd.xlane.f32.xlu1 %v609_v46 }
 0x2f7   : > { %v611_v47 = vpop.xlane.xlu1 %610 }
 0x2f8   : > { %v612_v48 = vmul.f32 0.00390625, %v611_v47 }
 0x2fa   : > { %v613_v49 = vadd.f32 1e-05, %v612_v48 }
 0x2fc   : > { %1392 = vrsqrt.f32 %v613_v49 }
 0x309   : > { %v1393_v50 = vpop.eup %1392 }
 0x30a   : > { %v617_v51 = vmul.f32 %v1393_v50, %v600_v37  ;;  %v616_v52 = vmul.f32 %v1393_v50, %v599_v36  ;;  %v615_v55 = vmul.f32 %v1393_v50, %v598_v35 }
 0x30c   : > { %v620_v53 = vmax.f32 %v617_v51, 0.0  ;;  %v619_v54 = vmax.f32 %v616_v52, 0.0  ;;  %v618_v56 = vmax.f32 %v615_v55, 0.0 }
 0x30e   : > { %632 = vrot.lane.b32.xlu1 %v620_v53, %s1591_s28  ;;  %630 = vrot.lane.b32.xlu0 %v619_v54, %s1591_s28 }
 0x312   : > { %628 = vrot.lane.b32.xlu0 %v618_v56, %s1591_s28 }
 0x380   : > { %v633_v57 = vpop.permute.xlu1 %632  ;;  %v631_v58 = vpop.permute.xlu0 %630 }
 0x381   : > { %v635_v59 = vsel %vm621_vm12, %v631_v58, %v633_v57 }
 0x382   : > { %643 = vst.msk [vmem:[#allocation3 + $0x10] sm:$0xff] %vm642_vm14, %v635_v59 }
 0x384   : > { %v629_v60 = vpop.permute.xlu0 %628 }
 0x385   : > { %640 = vst.msk [vmem:[#allocation3] sm:$0xff] %vm639_vm15, %v629_v60  ;;  %v634_v63 = vsel %vm621_vm12, %v629_v60, %v631_v58 }
 0x389   : > { %v651_v61 = vld [vmem:[#allocation3 + $0x10] sm:$0xff] }
 0x38a   : > { %653 = vrot.lane.b32.xlu0 %v651_v61, %s1592_s29 }
 0x38c   : > { %v644_v62 = vld [vmem:[#allocation3] sm:$0xff] }
 0x38d   : > { %646 = vrot.lane.b32.xlu1 %v644_v62, %s1582_s23 }
 0x38e   : > { %682 = vrot.lane.b32.xlu0 %v634_v63, %s1593_s27 }
 0x391   : > { %694 = vrot.lane.b32.xlu1 %v634_v63, %s1584_s7 }
 0x3fc   : > { %v654_v1 = vpop.permute.xlu0 %653 }
 0x3fd   : > { %657 = vst.msk [vmem:[#allocation3 + $0x10] sm:$0xff] %vm656_vm1, %v654_v1  ;;  %vm256_vm1 = vcmp.gt.f32.partialorder %v255_v9, 0.5 }
 0x3fe   : > { %v706_v16 = vsel %vm256_vm1, 1, %v1588_v4 }
 0x3ff   : > { %v647_v5 = vpop.permute.xlu1 %646  ;;  %v710_v21 = vrot.slane %v706_v16, %v1865_v12  ;;  %v718_v28 = vrot.slane %v706_v16, %v1869_v15  ;;  %v714_v4 = vrot.slane %v706_v16, %v1867_v13 }
 0x400   : > { %650 = vst.msk [vmem:[#allocation3] sm:$0xff] %vm649_vm13, %v647_v5  ;;  %v683_v10 = vpop.permute.xlu0 %682  ;;  %vm686_vm13 = vcmask 908288  }
 0x401   : > { %vm719_vm1 = vcmp.eq.s32.totalorder %v710_v21, 1  ;;  %vm721_vm7 = vcmp.eq.s32.totalorder %v718_v28, 1  ;;  %vm720_vm5 = vcmp.eq.s32.totalorder %v714_v4, 1 }
 0x403   : > { %v695_v11 = vpop.permute.xlu1 %694 }
 0x404   : > { %v660_v7 = vld [vmem:[#allocation3 + $0x10] sm:$0xff] }
 0x407   : > { %v658_v6 = vld [vmem:[#allocation3] sm:$0xff] }
 0x408   : > { %680 = vrot.lane.b32.xlu1 %v658_v6, %s1593_s27  ;;  %692 = vrot.lane.b32.xlu0 %v658_v6, %s1584_s7 }
 0x40c   : > { %722 = vrot.lane.b32.xlu1 %v658_v6, %s1594_s5  ;;  %696 = vrot.lane.b32.xlu0 %v660_v7, %s1584_s7 }
 0x410   : > { %724 = vrot.lane.b32.xlu0 %v634_v63, %s1594_s5  ;;  %684 = vrot.lane.b32.xlu1 %v660_v7, %s1593_s27 }
 0x414   : > { %726 = vrot.lane.b32.xlu1 %v660_v7, %s1594_s5 }
 0x47a   : > { %v681_v3 = vpop.permute.xlu1 %680  ;;  %v693_v14 = vpop.permute.xlu0 %692 }
 0x47b   : > { %v687_v26 = vsel %vm686_vm13, %v681_v3, %v683_v10  ;;  %v698_v27 = vsel %vm342_vm6, %v693_v14, %v695_v11 }
 0x47c   : > { %v703_v31 = vsel %vm674_vm10, %v687_v26, %v698_v27 }
 0x47e   : > { %v723_v22 = vpop.permute.xlu1 %722  ;;  %v697_v23 = vpop.permute.xlu0 %696 }
 0x47f   : > { %v699_v34 = vsel %vm342_vm6, %v695_v11, %v697_v23 }
 0x482   : > { %v685_v29 = vpop.permute.xlu1 %684  ;;  %v725_v30 = vpop.permute.xlu0 %724 }
 0x483   : > { %v729_v12 = vsel %vm728_vm11, %v723_v22, %v725_v30  ;;  %v688_v32 = vsel %vm686_vm13, %v683_v10, %v685_v29  ;;  %v705_v15 = vsel %vm676_vm9, %v685_v29, %v697_v23  ;;  %vm2108_vm9 = vcmask 900096  }
 0x484   : > { %v734_v33 = vsel %vm719_vm1, %v729_v12, %v703_v31  ;;  %v704_v36 = vsel %vm675_vm8, %v688_v32, %v699_v34  ;;  %vm2109_vm10 = vmmov %vm2108_vm9  ;;  %vm2112_vm13 = vcmask 588800  }
 0x485   : > { %740 = vrot.lane.b32.xlu0 %v734_v33, %s1591_s28 }
 0x486   : > { %v727_v35 = vpop.permute.xlu1 %726 }
 0x487   : > { %v730_v13 = vsel %vm728_vm11, %v725_v30, %v727_v35  ;;  %v736_v37 = vsel %vm721_vm7, %v727_v35, %v705_v15  ;;  %vm2113_vm11 = vmmov %vm2112_vm13 }
 0x488   : > { %v735_v38 = vsel %vm720_vm5, %v730_v13, %v704_v36  ;;  %vm2102_vm5 = vcmask 744448  }
 0x489   : > { %742 = vrot.lane.b32.xlu1 %v735_v38, %s1591_s28  ;;  %744 = vrot.lane.b32.xlu0 %v736_v37, %s1591_s28 }
 0x4f7   : > { %v741_v39 = vpop.permute.xlu0 %740 }
 0x4f8   : > { %751 = vst.msk [vmem:[#allocation3] sm:$0xff] %vm639_vm15, %v741_v39 }
 0x4fb   : > { %v743_v40 = vpop.permute.xlu1 %742  ;;  %v745_v41 = vpop.permute.xlu0 %744 }
 0x4fc   : > { %v1921_v42 = vsel %vm621_vm12, %v741_v39, %v743_v40  ;;  %v747_v43 = vsel %vm621_vm12, %v743_v40, %v745_v41 }
 0x4fd   : > { %753 = vst.msk [vmem:[#allocation3 + $0x10] sm:$0xff] %vm642_vm14, %v747_v43  ;;  %vm2110_vm14 = vcmask 1039360  }
 0x4fe   : > { %vm2111_vm15 = vmmov %vm2110_vm14 }
 0x4ff   : > { %v1925_v44 = vld [vmem:[#allocation3] sm:$0xff] }
 0x500   : > { %906 = vrot.lane.b32.xlu1 %v1925_v44, %s1581_s21  ;;  %866 = vrot.lane.b32.xlu0 %v1925_v44, %s1582_s23 }
 0x504   : > { %v756_v45 = vld [vmem:[#allocation3 + $0x10] sm:$0xff]  ;;  %886 = vrot.lane.b32.xlu1 %v1925_v44, %s1583_s30  ;;  %826 = vrot.lane.b32.xlu0 %v1925_v44, %s1584_s7 }
 0x505   : > { %759 = vst.msk [vmem:[#allocation2 + $0x10] sm:$0xff] %vm265_vm0, %v756_v45 }
 0x508   : > { %846 = vrot.lane.b32.xlu1 %v1925_v44, %s1585_s9  ;;  %786 = vrot.lane.b32.xlu0 %v1925_v44, %s1586_s10 }
 0x50c   : > { %806 = vrot.lane.b32.xlu1 %v1925_v44, %s1587_s20  ;;  %908 = vrot.lane.b32.xlu0 %v1921_v42, %s1581_s21 }
 0x510   : > { %868 = vrot.lane.b32.xlu0 %v1921_v42, %s1582_s23  ;;  %910 = vrot.lane.b32.xlu1 %v756_v45, %s1581_s21  ;;  %s1137_s21 = sshll.u32 %s251_s12, 4  ;;  %s2031_s21 = int_to_ptr.vmem [resolvable:$true] %s1137_s21 }
 0x511   : > { %s1502_s11 = scalar_lea.vmem %s2031_s21, 384 }
 0x512   : > { %p1503_p12 = scmp.ne.s32.totalorder %s2031_s21, %s1502_s11 }
 0x514   : > { %888 = vrot.lane.b32.xlu0 %v1921_v42, %s1583_s30  ;;  %870 = vrot.lane.b32.xlu1 %v756_v45, %s1582_s23  ;;  %p1504_p7 = pnand %p1503_p12, %p2114_p5 }
 0x516   : > { %p1505_p10 = pneg %p1504_p7 }
 0x518   : > { %828 = vrot.lane.b32.xlu0 %v1921_v42, %s1584_s7  ;;  %890 = vrot.lane.b32.xlu1 %v756_v45, %s1583_s30  ;;  %s2029_s30 = scalar_lea.hbm %s2078_s4, %s1299_s6 }
 0x51c   : > { %848 = vrot.lane.b32.xlu0 %v1921_v42, %s1585_s9  ;;  %830 = vrot.lane.b32.xlu1 %v756_v45, %s1584_s7 }
 0x520   : > { %788 = vrot.lane.b32.xlu0 %v1921_v42, %s1586_s10  ;;  %850 = vrot.lane.b32.xlu1 %v756_v45, %s1585_s9 }
 0x524   : > { %808 = vrot.lane.b32.xlu0 %v1921_v42, %s1587_s20  ;;  %790 = vrot.lane.b32.xlu1 %v756_v45, %s1586_s10 }
 0x528   : > { %768 = vrot.lane.b32.xlu0 %v1921_v42, %s1589_s24  ;;  %810 = vrot.lane.b32.xlu1 %v756_v45, %s1587_s20 }
 0x52c   : > { %766 = vrot.lane.b32.xlu0 %v1925_v44, %s1589_s24  ;;  %770 = vrot.lane.b32.xlu1 %v756_v45, %s1589_s24 }
 0x572   : > { %v907_v46 = vpop.permute.xlu1 %906  ;;  %v867_v47 = vpop.permute.xlu0 %866 }
 0x576   : > { %v887_v48 = vpop.permute.xlu1 %886  ;;  %v827_v49 = vpop.permute.xlu0 %826 }
 0x57a   : > { %v847_v50 = vpop.permute.xlu1 %846  ;;  %v787_v51 = vpop.permute.xlu0 %786 }
 0x57e   : > { %v807_v52 = vpop.permute.xlu1 %806  ;;  %v909_v53 = vpop.permute.xlu0 %908 }
 0x57f   : > { %v912_v54 = vsel %vm426_vm2, %v907_v46, %v909_v53 }
 0x580   : > { %v960_v57 = vpack.c.bf16 %v912_v54, %v912_v54 }
 0x582   : > { %v911_v55 = vpop.permute.xlu1 %910  ;;  %v869_v56 = vpop.permute.xlu0 %868  ;;  %v967_v63 = vsel %vm482_vm3, %v960_v57, 0 }
 0x583   : > { %v913_v58 = vsel %vm426_vm2, %v909_v53, %v911_v55  ;;  %919 = vst.msk [vmem:[#allocation2 + $0xd0] sm:$0xff] %vm265_vm0, %v911_v55  ;;  %v872_v59 = vsel %vm384_vm4, %v867_v47, %v869_v56  ;;  %vm2103_vm2 = vmmov %vm2102_vm5 }
 0x584   : > { %v961_v60 = vpack.c.bf16 %v913_v58, %v913_v58 }
 0x586   : > { %v871_v61 = vpop.permute.xlu1 %870  ;;  %v889_v62 = vpop.permute.xlu0 %888  ;;  %1250 = vmatprep.subr.msk.bf16.mxu0 %vm482_vm3, %v961_v60 }
 0x587   : > { %v873_v1 = vsel %vm384_vm4, %v869_v56, %v871_v61  ;;  %879 = vst.msk [vmem:[#allocation2 + $0xa0] sm:$0xff] %vm265_vm0, %v871_v61  ;;  %v892_v5 = vsel %vm2102_vm5, %v887_v48, %v889_v62  ;;  %982 = vmatpush1.bf16.msra.mxu0 %v967_v63  ;;  %vm2104_vm4 = vcmask 883712  }
 0x588   : > { %v957_v14 = vpack.c.bf16 %v892_v5, %v872_v59  ;;  %vm2105_vm7 = vmmov %vm2104_vm4 }
 0x58a   : > { %v891_v6 = vpop.permute.xlu1 %890  ;;  %v829_v7 = vpop.permute.xlu0 %828  ;;  %v947_v8 = vld [vmem:[#allocation2 + $0xd0] sm:$0xff] }
 0x58b   : > { %v893_v9 = vsel %vm2103_vm2, %v889_v62, %v891_v6  ;;  %899 = vst.msk [vmem:[#allocation2 + $0xb8] sm:$0xff] %vm265_vm0, %v891_v6  ;;  %v832_v10 = vsel %vm342_vm6, %v827_v49, %v829_v7  ;;  %v962_v11 = vpack.c.bf16 %v947_v8, %v947_v8 }
 0x58c   : > { %v958_v2 = vpack.c.bf16 %v893_v9, %v873_v1 }
 0x58d   : > { %v973_v3 = vsel %vm482_vm3, %v962_v11, 0  ;;  %vm2106_vm3 = vcmask 1031168  }
 0x58e   : > { %1283 = vmatpush3.bf16.msra.mxu1 %v973_v3  ;;  %v831_v16 = vpop.permute.xlu1 %830  ;;  %v849_v19 = vpop.permute.xlu0 %848  ;;  %983 = vmatprep.subr.bf16.mxu0 %v958_v2  ;;  %v941_v25 = vld [vmem:[#allocation2 + $0xa0] sm:$0xff]  ;;  %vm2107_vm8 = vmmov %vm2106_vm3 }
 0x58f   : > { %v833_v21 = vsel %vm342_vm6, %v829_v7, %v831_v16  ;;  %839 = vst.msk [vmem:[#allocation2 + $0x70] sm:$0xff] %vm265_vm0, %v831_v16  ;;  %v852_v22 = vsel %vm2104_vm4, %v847_v50, %v849_v19  ;;  %1284 = vmatprep.subr.bf16.mxu1 %v1580_v0  ;;  %984 = vmatpush1.bf16.msra.mxu0 %v957_v14 }
 0x590   : > { %v954_v30 = vpack.c.bf16 %v852_v22, %v832_v10 }
 0x592   : > { %v851_v23 = vpop.permute.xlu1 %850  ;;  %v789_v24 = vpop.permute.xlu0 %788  ;;  %v944_v26 = vld [vmem:[#allocation2 + $0xb8] sm:$0xff] }
 0x593   : > { %v853_v27 = vsel %vm2105_vm7, %v849_v19, %v851_v23  ;;  %859 = vst.msk [vmem:[#allocation2 + $0x88] sm:$0xff] %vm265_vm0, %v851_v23  ;;  %v792_v28 = vsel %vm2106_vm3, %v787_v51, %v789_v24  ;;  %v959_v4 = vpack.c.bf16 %v944_v26, %v941_v25  ;;  %v920_v51 = vld [vmem:[#allocation9] sm:$0xf] }
 0x594   : > { %v955_v29 = vpack.c.bf16 %v853_v27, %v833_v21 }
 0x595   : > { %1285 = vmatpush3.bf16.msra.mxu1 %v959_v4  ;;  %v1086_v4 = vld [vmem:[%s1760_s13 + $0x8] sm:$0xff] }
 0x596   : > { %v791_v12 = vpop.permute.xlu1 %790  ;;  %v809_v31 = vpop.permute.xlu0 %808  ;;  %1286 = vmatprep.subr.bf16.mxu1 %v1580_v0  ;;  %985 = vmatprep.subr.bf16.mxu0 %v955_v29  ;;  %v935_v35 = vld [vmem:[#allocation2 + $0x70] sm:$0xff] }
 0x597   : > { %v793_v32 = vsel %vm2107_vm8, %v789_v24, %v791_v12  ;;  %799 = vst.msk [vmem:[#allocation2 + $0x40] sm:$0xff] %vm265_vm0, %v791_v12  ;;  %v812_v33 = vsel %vm2108_vm9, %v807_v52, %v809_v31  ;;  %986 = vmatpush1.bf16.msra.mxu0 %v954_v30  ;;  %v923_v52 = vld [vmem:[#allocation2 + $0x10] sm:$0xff] }
 0x598   : > { %v951_v39 = vpack.c.bf16 %v812_v33, %v792_v28  ;;  %v1085_v28 = vld [vmem:[%s1760_s13] sm:$0xff]  ;;  %v1087_v33 = vld [vmem:[%s1760_s13 + $0x10] sm:$0xff] }
 0x59a   : > { %v811_v34 = vpop.permute.xlu1 %810  ;;  %v769_v15 = vpop.permute.xlu0 %768  ;;  %v938_v13 = vld [vmem:[#allocation2 + $0x88] sm:$0xff] }
 0x59b   : > { %v813_v36 = vsel %vm2109_vm10, %v809_v31, %v811_v34  ;;  %819 = vst.msk [vmem:[#allocation2 + $0x58] sm:$0xff] %vm265_vm0, %v811_v34  ;;  %v956_v37 = vpack.c.bf16 %v938_v13, %v935_v35 }
 0x59c   : > { %v952_v38 = vpack.c.bf16 %v813_v36, %v793_v32 }
 0x59d   : > { %1287 = vmatpush3.bf16.msra.mxu1 %v956_v37 }
 0x59e   : > { %v771_v40 = vpop.permute.xlu1 %770  ;;  %v767_v41 = vpop.permute.xlu0 %766  ;;  %1288 = vmatprep.subr.bf16.mxu1 %v1580_v0  ;;  %987 = vmatprep.subr.bf16.mxu0 %v952_v38  ;;  %v929_v48 = vld [vmem:[#allocation2 + $0x40] sm:$0xff] }
 0x59f   : > { %v773_v43 = vsel %vm2110_vm14, %v769_v15, %v771_v40  ;;  %779 = vst.msk [vmem:[#allocation2 + $0x28] sm:$0xff] %vm265_vm0, %v771_v40  ;;  %v772_v45 = vsel %vm2111_vm15, %v767_v41, %v769_v15  ;;  %988 = vmatpush1.bf16.msra.mxu0 %v951_v39 }
 0x5a0   : > { %v949_v46 = vpack.c.bf16 %v773_v43, %v1921_v42  ;;  %v948_v47 = vpack.c.bf16 %v772_v45, %v1925_v44 }
 0x5a2   : > { %v932_v49 = vld [vmem:[#allocation2 + $0x58] sm:$0xff]  ;;  %989 = vmatprep.subr.bf16.mxu0 %v949_v46 }
 0x5a3   : > { %v953_v50 = vpack.c.bf16 %v932_v49, %v929_v48  ;;  %990 = vmatpush1.bf16.msra.mxu0 %v948_v47 }
 0x5a5   : > { %1289 = vmatpush3.bf16.msra.mxu1 %v953_v50 }
 0x5a6   : > { %1290 = vmatprep.subr.bf16.mxu1 %v1580_v0  ;;  %v926_v53 = vld [vmem:[#allocation2 + $0x28] sm:$0xff]  ;;  %1251 = vmatmul.mubr.msk.bf16.vlgmr.msra.gmra.mxu0 %vm2112_vm13, %v920_v51 }
 0x5a7   : > { %v950_v54 = vpack.c.bf16 %v926_v53, %v923_v52 }
 0x5a9   : > { %1291 = vmatpush3.bf16.msra.mxu1 %v950_v54 }
 0x5ac   : > { %1293 = vmatmul.mubr.msk.bf16.vlgmr.msra.gmra.mxu1 %vm2113_vm11, %v920_v51 }
 0x666   : > { %v1009_v42 = vpop.f32.mrf.mxu0 }
 0x667   : > { %v1056_v44 = vmul.f32 %v1009_v42, %v1872_v17 }
 0x668   : > { %v1011_v55 = vpop.f32.mrf.mxu0 }
 0x669   : > { %v1057_v56 = vmul.f32 %v1011_v55, %v1875_v18 }
 0x66a   : > { %v1013_v57 = vpop.f32.mrf.mxu0 }
 0x66b   : > { %v1059_v61 = vadd.f32 %v1057_v56, %v1056_v44 }
 0x66c   : > { %v1050_v58 = vpop.f32.mrf.mxu1  ;;  %v1014_v59 = vpop.f32.mrf.mxu0 }
 0x66d   : > { %v1058_v60 = vmul.f32 %v1050_v58, %v1878_v20 }
 0x66e   : > { %v1294_v0 = vpop.f32.mrf.mxu1 }
 0x66f   : > { %v1060_v62 = vsel %vm265_vm0, %v1058_v60, 0.0 }
 0x670   : > { %v1053_v63 = vpop.f32.mrf.mxu1  ;;  %v1061_v1 = vadd.f32 %v1060_v62, %v1059_v61 }
 0x672   : > { %v1295_v5 = vpop.f32.mrf.mxu1  ;;  %1062 = vadd.xlane.f32.xlu1 %v1061_v1 }
 0x6fb   : > { %v1063_v6 = vpop.xlane.xlu1 %1062 }
 0x6fc   : > { %v1064_v7 = vmul.f32 0.00390625, %v1063_v6 }
 0x6fe   : > { %v1065_v8 = vsub.f32 %v1009_v42, %v1064_v7  ;;  %v1066_v9 = vsub.f32 %v1011_v55, %v1064_v7  ;;  %v1067_v10 = vsub.f32 %v1050_v58, %v1064_v7 }
 0x700   : > { %v1068_v11 = vmul.f32 %v1065_v8, %v1872_v17  ;;  %v1069_v2 = vmul.f32 %v1066_v9, %v1875_v18  ;;  %v1070_v3 = vmul.f32 %v1067_v10, %v1878_v20 }
 0x702   : > { %v1071_v14 = vmul.f32 %v1068_v11, %v1068_v11  ;;  %v1072_v16 = vmul.f32 %v1069_v2, %v1069_v2  ;;  %v1073_v19 = vmul.f32 %v1070_v3, %v1070_v3 }
 0x704   : > { %v1074_v21 = vadd.f32 %v1072_v16, %v1071_v14  ;;  %v1075_v22 = vsel %vm265_vm0, %v1073_v19, 0.0 }
 0x706   : > { %v1076_v23 = vadd.f32 %v1075_v22, %v1074_v21 }
 0x708   : > { %1077 = vadd.xlane.f32.xlu0 %v1076_v23 }
 0x791   : > { %v1078_v24 = vpop.xlane.xlu0 %1077 }
 0x792   : > { %v1079_v25 = vmul.f32 0.00390625, %v1078_v24 }
 0x794   : > { %v1080_v26 = vadd.f32 1e-05, %v1079_v25 }
 0x796   : > { %1394 = vrsqrt.f32 %v1080_v26 }
 0x7a3   : > { %v1395_v17 = vpop.eup %1394 }
 0x7a4   : > { %v1083_v27 = vmul.f32 %v1395_v17, %v1066_v9  ;;  %v1082_v18 = vmul.f32 %v1395_v17, %v1065_v8  ;;  %v1084_v20 = vmul.f32 %v1395_v17, %v1067_v10 }
 0x7a6   : > { %1093 = vrot.lane.b32.xlu1 %v1083_v27, %s1591_s28  ;;  %1091 = vrot.lane.b32.xlu0 %v1082_v18, %s1591_s28 }
 0x7aa   : > { %1095 = vrot.lane.b32.xlu1 %v1084_v20, %s1591_s28 }
 0x818   : > { %v1094_v29 = vpop.permute.xlu1 %1093  ;;  %v1092_v30 = vpop.permute.xlu0 %1091 }
 0x819   : > { %v1097_v12 = vsel %vm621_vm12, %v1092_v30, %v1094_v29  ;;  %v1102_v31 = vadd.f32 %v1092_v30, %v1085_v28 }
 0x81a   : > { %v1103_v32 = vadd.f32 %v1097_v12, %v1086_v4 }
 0x81b   : > { %1108 = vrot.lane.b32.xlu0 %v1102_v31, %s1584_s7 }
 0x81c   : > { %v1096_v34 = vpop.permute.xlu1 %1095  ;;  %1110 = vrot.lane.b32.xlu1 %v1103_v32, %s1584_s7 }
 0x81d   : > { %v1098_v15 = vsel %vm621_vm12, %v1094_v29, %v1096_v34 }
 0x81e   : > { %v1104_v35 = vadd.f32 %v1098_v15, %v1087_v33 }
 0x820   : > { %1112 = vrot.lane.b32.xlu0 %v1104_v35, %s1584_s7  ;;  %s1595_s7 = smov [#allocation12]  }
 0x821   : > { %s1506_s9 = sshll.u32 %s1595_s7, 4  ;;  %s1507_s9 = int_to_ptr.vmem [resolvable:$false] %s1506_s9 }
 0x822   : > { %s1508_s10 = scalar_lea.vmem %s1507_s9, 768  ;;  %p1509_p13 = scmp.lt.s32.totalorder %s2031_s21, %s1507_s9 }
 0x823   : > { %p1510_p0 = scmp.lt.s32.totalorder %s1508_s10, %s1502_s11 }
 0x825   : > { %p1511_p1 = por %p1510_p0, %p1509_p13 }
 0x827   : > { %p1512_p3 = pnand %p1511_p1, %p1505_p10 }
 0x88d   : > { %v1109_v13 = vpop.permute.xlu0 %1108 }
 0x88e   : > { %v1111_v36 = vpop.permute.xlu1 %1110 }
 0x88f   : > { %v1114_v37 = vsel %vm342_vm6, %v1109_v13, %v1111_v36 }
 0x890   : > { %1119 = vst [vmem:[%s251_s12] sm:$0xff] %v1114_v37 }
 0x892   : > { %v1113_v38 = vpop.permute.xlu0 %1112 }
 0x893   : > { %v1115_v39 = vsel %vm342_vm6, %v1111_v36, %v1113_v38  ;;  %1121 = vst.msk [vmem:[%s251_s12 + $0x10] sm:$0xff] %vm265_vm0, %v1113_v38 }
 0x894   : > { %1120 = vst [vmem:[%s251_s12 + $0x8] sm:$0xff] %v1115_v39 }
 0x895   : > { %1515 = shalt.err (!%p1512_p3)
}
 0x896   : > { %s1516_s20 = scalar_lea.hbm %s2029_s30, 384  ;;  %s1520_s28 = scalar_lea.hbm %s2078_s4, 768 }
 0x897   : > { %p1517_p4 = scmp.ne.s32.totalorder %s2029_s30, %s1516_s20  ;;  %p1521_p2 = scmp.lt.s32.totalorder %s2029_s30, %s2078_s4 }
 0x898   : > { %p1522_p6 = scmp.lt.s32.totalorder %s1520_s28, %s1516_s20 }
 0x899   : > { %p1518_p9 = pnand %p1517_p4, %p2114_p5 }
 0x89a   : > { %p1523_p8 = por %p1522_p6, %p1521_p2 }
 0x89b   : > { %p1519_p11 = pneg %p1518_p9 }
 0x89d   : > { %p1524_p12 = pnand %p1523_p8, %p1519_p11 }
 0x89f   : > { %1527 = shalt.err (!%p1524_p12)
}
 0x8a0   : > { %1314 = dma.vmem_to_hbm [thread:$0]  (%p2114_p5), %s2031_s21, 384, %s2029_s30, %s1123_s19  }
 0x8a1 PF: > { %s1149_s5 = sand.u32 1, %s1562_s15   ;;  %p2115_p7 = scmp.ne.s32.totalorder %s2090_s22, 0 }
 0x8a2   : > { %p2116_p10 = scmp.ge.s32.totalorder %s1574_s18, 2  ;;  %s1150_s6 = scalar_lea.sflag [#allocation6], %s1149_s5 }
 0x8a4   : > { %p1331_p13 = pnand %p2116_p10, %p2115_p7 }
 0x8a6   : > { %p1332_p0 = pneg %p1331_p13 }
 0x8a8   : > { %1557 = dma.done.wait (%p1332_p0), %s1150_s6, 384  }
 0x8a9   : > { %1559 = vsyncadd (%p1332_p0), %s1150_s6, 4294966912  ;;  %p19_p1 = scmp.ge.s32.totalorder %s1708_s14, 4   ;;  %s2117_s15 = smov %s1566_s16 }
 0x8aa   : > { %s2118_s16 = smov %s1570_s17  ;;  %s2119_s17 = smov %s1718_s25 }
 0x8ab   : > { %s2120_s18 = smov %s1708_s14  ;;  %21 = sbr.rel (!%p19_p1) target bundleno = 7 (0x7), region = 95 }
 0x8b0   :  { %1155 = vsyncpa [#allocation5], 1 }
 0x8b1   :  { %1157 = vsyncpa [#allocation5 + $0x1], 1 }
 0x8b2   :  { %1158 = vsyncpa [#allocation8], 1 }
 0x8b3   :  { %1159 = vsyncpa [#allocation11], 1 }
 0x8b4   :  { %1160 = vsyncpa [#allocation6], 1 }
 0x8b5   :  { %1162 = vsyncpa [#allocation6 + $0x1], 1 }

</bundles_post_ra>
